<compile_context>
chip_gen: v7x
topology: tpu7x:2x2x1
jax: 0.10.0
libtpu: 0.0.40
codegen_flags: <defaults>
</compile_context>

<pallas_src>
import functools

import jax
import jax.numpy as jnp
from jax import lax
from jax.experimental import pallas as pl
from jax.experimental.pallas import tpu as pltpu


def _round_up(x, m):
    return ((x + m - 1) // m) * m


def _leaky(x, a=0.2):
    return jnp.where(x >= 0, x, a * x)


# ----------------------------------------------------------------------------
# Pallas kernel A: one-time support-side precompute.
#   sup (S, c) f32  ->  wsn (S, c) bf16 (L2-normalized W(support)), supn (S, c) bf16
# ----------------------------------------------------------------------------
def _support_prep_kernel(sup_ref, wfT_ref, bnb_ref, wsn_ref, supn_ref):
    f32 = jnp.float32
    bf16 = jnp.bfloat16
    sup = sup_ref[...]                                        # (S, c) f32

    def rownorm(x):                                           # L2 normalize along channels
        ss = jnp.maximum(jnp.sum(x * x, axis=-1, keepdims=True), 1e-24)
        return x * lax.rsqrt(ss)

    # 1x1 conv (BN scale folded into the weight, weight pre-transposed) + bias + LeakyReLU
    ws = jnp.dot(sup.astype(bf16), wfT_ref[...], preferred_element_type=f32)
    ws = _leaky(ws + bnb_ref[...])
    wsn_ref[...] = rownorm(ws).astype(bf16)                   # normalized transformed support
    supn_ref[...] = rownorm(sup).astype(bf16)                 # normalized raw support


# ----------------------------------------------------------------------------
# Pallas kernel B: main metric-layer kernel.
#   One grid step processes a (tr, c) tile of query pixels (whole batch collapsed into
#   the row dimension; no transpose anywhere).
#   Outputs per tile:
#     num_ref (tr, s8): per-support-image  sum_p clamp_fx * match, already scaled by 1/||q||
#     den_ref (tr, g8): per-support-set    sum_p clamp_fx   (AEA L1 denominator)
# ----------------------------------------------------------------------------
def _tl_main_kernel(q_ref, stackA_ref, stackB_ref, bnb_ref, b1_ref, w2_ref, b2_ref,
                    img_ind_ref, set_ind_ref, num_ref, den_ref,
                    *, s_cols, atten_scale, from_value, value_interval):
    f32 = jnp.float32
    bf16 = jnp.bfloat16

    q = q_ref[...]                                            # (tr, c) bf16
    qf = q.astype(f32)
    inv_qn = lax.rsqrt(jnp.maximum(jnp.sum(qf * qf, axis=-1, keepdims=True), 1e-24))  # (tr,1)

    # matmul 1: q @ [supn^T | wfold^T]  -> raw match + W transform, one MXU pass set
    outA = jnp.dot(q, stackA_ref[...], preferred_element_type=f32)   # (tr, s_cols + 128)
    match = outA[:, :s_cols]                                         # (tr, s_cols) un-normalized
    wq = _leaky(outA[:, s_cols:] + bnb_ref[...])                     # (tr, 128), tail cols == 0
    inv_wn = lax.rsqrt(jnp.maximum(jnp.sum(wq * wq, axis=-1, keepdims=True), 1e-24))
    wqn = (wq * inv_wn).astype(bf16)                                 # (tr, 128)

    # matmul 2: wqn @ [wsn^T | psi_W1^T] -> cosine f_x + psi hidden, one MXU pass set
    outB = jnp.dot(wqn, stackB_ref[...], preferred_element_type=f32) # (tr, s_cols + 128)
    f_x = outB[:, :s_cols]
    h1 = _leaky(outB[:, s_cols:] + b1_ref[...])                      # (tr, 128)
    logit = jnp.sum(h1 * w2_ref[...], axis=-1, keepdims=True) + b2_ref[0]
    clamp_v = jax.nn.sigmoid(logit) * value_interval + from_value    # (tr, 1)

    # AEA gating (per-set L1 normalization is finished outside via den)
    clamp_fx = jax.nn.sigmoid(atten_scale * (f_x - clamp_v))         # (tr, s_cols)
    raw = (clamp_fx * match).astype(bf16)                            # padded cols are exactly 0

    # per-support-image numerator / per-support-set L1 denominator (indicator matmuls)
    num = jnp.dot(raw, img_ind_ref[...], preferred_element_type=f32)                  # (tr, s8)
    den = jnp.dot(clamp_fx.astype(bf16), set_ind_ref[...], preferred_element_type=f32)  # (tr, g8)
    num_ref[...] = num * inv_qn        # fold the query L2 norm into the numerator
    den_ref[...] = den


# ----------------------------------------------------------------------------
# Generation-aware row-tile / VMEM-limit choice (review items 4-7).
# ----------------------------------------------------------------------------
def _choose_row_tile(rows, sw, device_kind):
    kind = device_kind.lower()
    if 'v7' in kind:
        cap, phys = 512, 64 << 20                 # 64 MiB VMEM, 2 TCs
    elif 'v6' in kind:
        cap, phys = 1024, 128 << 20
    elif 'v5' in kind and ('lite' in kind or 'v5e' in kind):
        cap, phys = 256, 128 << 20                # v5e: 1 vst slot, keep tiles small
    elif 'v5' in kind:
        cap, phys = 1024, 128 << 20               # v5p
    else:
        cap, phys = 512, 64 << 20                 # unknown: be conservative
    budget = int(phys * 0.70)
    # grid-invariant inputs are double-buffered by the pipeline
    invariant = 2 * ((64 + 128) * sw * 2 + sw * 16 * 2 + 4 * 128 * 4)

    def fits(t):
        # ~7 live f32 (t, sw) temporaries + bf16 copies + double-buffered q tile / outputs
        live = t * sw * (7 * 4 + 2 * 2) + 2 * t * 64 * 2 + 4 * t * 16 * 4
        return live + invariant <= budget

    row_cap = max(128, min(cap, _round_up(rows, 128)))
    cands = [t for t in (1024, 512, 256, 128) if t <= row_cap and fits(t)]
    if not cands:
        cands = [128]
    tr = cands[0]
    if 'v7' in kind:                              # prefer an even grid for the 2 TensorCores
        for t in cands:
            steps = -(-rows // t)
            if steps >= 2 and steps % 2 == 0:
                tr = t
                break
    vmem_limit = min(int(phys * 0.95), budget + (24 << 20))
    return tr, vmem_limit


# ----------------------------------------------------------------------------
# TLModule wrapper: layout plumbing + the two pallas_calls + tiny JAX epilogue.
# Features come in NHWC: qf (b, h, w, c), sf (s_total, h, w, c);
# sf is the concatenation of n_sets equal-size support sets along axis 0.
# ----------------------------------------------------------------------------
def tl_module_forward(p, qf, sf, n_sets, *, scale_value=30.0, atten_scale=50.0,
                      from_value=0.5, value_interval=0.3):
    b, h, w, c = qf.shape
    s_total = sf.shape[0]
    assert s_total % n_sets == 0
    s_per = s_total // n_sets
    hw = h * w
    rows = b * hw
    S = s_total * hw
    c16 = p['psi_w1'].shape[0]
    assert c <= 128 and c16 <= 128
    f32, bf16 = jnp.float32, jnp.bfloat16

    # fold BN(eval) scale into the 1x1 conv weight; pre-transpose to (c_in, c_out)
    eps = 1e-5
    bn_scale = p['W_bn_g'] / jnp.sqrt(p['W_bn_v'] + eps)             # (c,)
    wfold = p['W_conv_w'].reshape(c, c) * bn_scale[:, None]          # (c_out, c_in)
    wfT = wfold.T.astype(bf16)                                       # (c_in, c_out)
    bnb = (p['W_bn_b'] - p['W_bn_m'] * bn_scale).astype(f32)         # (c,)

    # ---- kernel A: support-side precompute (runs once per forward) ----
    sup = sf.reshape(S, c).astype(f32)
    wsn, supn = pl.pallas_call(
        _support_prep_kernel,
        out_shape=(jax.ShapeDtypeStruct((S, c), bf16),
                   jax.ShapeDtypeStruct((S, c), bf16)),
        grid_spec=pltpu.PrefetchScalarGridSpec(
            num_scalar_prefetch=0, grid=(1,),
            in_specs=[pl.BlockSpec((S, c), lambda i: (0, 0)),
                      pl.BlockSpec((c, c), lambda i: (0, 0)),
                      pl.BlockSpec((1, c), lambda i: (0, 0))],
            out_specs=[pl.BlockSpec((S, c), lambda i: (0, 0)),
                       pl.BlockSpec((S, c), lambda i: (0, 0))]),
        compiler_params=pltpu.CompilerParams(dimension_semantics=("arbitrary",)),
    )(sup, wfT, bnb.reshape(1, c))

    # ---- build the stacked, lane-aligned RHS blocks (support columns first) ----
    s_cols = _round_up(S, 128)            # support columns, 128-aligned
    sw = s_cols + 128                     # + a 128-wide tail for the small weight blocks
    pad_s = s_cols - S

    supnT = supn.T                                                    # (c, S) bf16
    wsnT = wsn.T
    zpad = jnp.zeros((c, pad_s), bf16)
    wf_block = jnp.concatenate([wfT, jnp.zeros((c, 128 - c), bf16)], axis=1)        # (c, 128)
    w1T = p['psi_w1'].astype(f32).T                                                  # (c, c16)
    w1_block = jnp.concatenate([w1T.astype(bf16), jnp.zeros((c, 128 - c16), bf16)], axis=1)

    stackA = jnp.concatenate([supnT, zpad, wf_block], axis=1)         # (c, sw)
    stackB_top = jnp.concatenate([wsnT, zpad, w1_block], axis=1)      # (c, sw)
    stackB = jnp.concatenate([stackB_top, jnp.zeros((128 - c, sw), bf16)], axis=0)   # (128, sw)

    bnb_row = jnp.zeros((1, 128), f32).at[0, :c].set(bnb)
    b1_row = jnp.zeros((1, 128), f32).at[0, :c16].set(p['psi_b1'].astype(f32))
    w2_row = jnp.zeros((1, 128), f32).at[0, :c16].set(p['psi_w2'].reshape(-1).astype(f32))
    b2 = p['psi_b2'].reshape(1).astype(f32)

    # ---- 0/1 indicators: per-support-image numerator, per-support-SET L1 denominator ----
    s8 = max(8, _round_up(s_total, 8))
    g8 = max(8, _round_up(n_sets, 8))
    pix = jnp.arange(s_cols)
    valid = pix < S
    img_ind = (((pix[:, None] // hw) == jnp.arange(s8)[None, :])
               & valid[:, None]).astype(bf16)                          # (s_cols, s8)
    set_ind = (((pix[:, None] // (s_per * hw)) == jnp.arange(g8)[None, :])
               & valid[:, None]).astype(bf16)                          # (s_cols, g8)

    # ---- query rows: natural layout, bf16, zero-padded to a multiple of the row tile ----
    tr, vmem_limit = _choose_row_tile(rows, sw, jax.devices()[0].device_kind)
    rows_pad = _round_up(rows, tr)
    q_rows = qf.reshape(rows, c).astype(bf16)
    if rows_pad != rows:
        q_rows = jnp.pad(q_rows, ((0, rows_pad - rows), (0, 0)))

    kernel = functools.partial(_tl_main_kernel, s_cols=s_cols,
                               atten_scale=float(atten_scale),
                               from_value=float(from_value),
                               value_interval=float(value_interval))

    num, den = pl.pallas_call(
        kernel,
        out_shape=(jax.ShapeDtypeStruct((rows_pad, s8), f32),
                   jax.ShapeDtypeStruct((rows_pad, g8), f32)),
        grid_spec=pltpu.PrefetchScalarGridSpec(
            num_scalar_prefetch=0, grid=(rows_pad // tr,),
            in_specs=[
                pl.BlockSpec((tr, c), lambda i: (i, 0)),            # streaming query rows
                pl.BlockSpec((c, sw), lambda i: (0, 0)),            # [supn^T | wfold^T]
                pl.BlockSpec((128, sw), lambda i: (0, 0)),          # [wsn^T  | psi_W1^T]
                pl.BlockSpec((1, 128), lambda i: (0, 0)),           # folded BN bias row
                pl.BlockSpec((1, 128), lambda i: (0, 0)),           # psi b1 row
                pl.BlockSpec((1, 128), lambda i: (0, 0)),           # psi W2 row
                pl.BlockSpec(memory_space=pltpu.MemorySpace.SMEM),  # psi b2 scalar
                pl.BlockSpec((s_cols, s8), lambda i: (0, 0)),       # per-image indicator
                pl.BlockSpec((s_cols, g8), lambda i: (0, 0)),       # per-set indicator
            ],
            out_specs=[pl.BlockSpec((tr, s8), lambda i: (i, 0)),
                       pl.BlockSpec((tr, g8), lambda i: (i, 0))]),
        compiler_params=pltpu.CompilerParams(
            dimension_semantics=("parallel",),
            vmem_limit_bytes=int(vmem_limit)),
    )(q_rows, stackA, stackB, bnb_row, b1_row, w2_row, b2, img_ind, set_ind)

    # ---- tiny epilogue in plain JAX: per-set L1 division, layout, mean, scale ----
    num = num[:rows, :s_total]
    den = jnp.maximum(den[:rows, :n_sets], 1e-12)
    local = (num.reshape(rows, n_sets, s_per) / den[:, :, None]).reshape(b, hw, s_total)
    local = jnp.transpose(local, (0, 2, 1))                     # (b, s_total, hw)
    score = jnp.mean(local, axis=-1) * scale_value              # (b, s_total)
    return score, local


# ----------------------------------------------------------------------------
# Conv64F encoder (plain-JAX glue, NHWC; see TODO at top).
# ----------------------------------------------------------------------------
def cnn_encoder(p, x_nchw):
    x = jnp.transpose(x_nchw, (0, 2, 3, 1))                    # NCHW -> NHWC
    for i in range(4):
        wgt = jnp.transpose(p[f'conv{i}_w'], (2, 3, 1, 0))     # OIHW -> HWIO
        x = lax.conv_general_dilated(
            x, wgt, (1, 1), 'SAME',
            dimension_numbers=('NHWC', 'HWIO', 'NHWC'))
        scale = p[f'bn{i}_g'] / jnp.sqrt(p[f'bn{i}_v'] + 1e-5)
        shift = p[f'bn{i}_b'] - p[f'bn{i}_m'] * scale
        x = _leaky(x * scale + shift)
        if i < 2:
            x = lax.reduce_window(x, -jnp.inf, lax.max,
                                  (1, 2, 2, 1), (1, 2, 2, 1), 'VALID')
    return x                                                    # (n, h', w', c)


# ----------------------------------------------------------------------------
# TLNet forward (all support sets fused into one metric-layer launch; the AEA
# attention mask is still L1-normalized per support set, matching the original).
# ----------------------------------------------------------------------------
def tlnet_forward(params, query_data, support_data_list):
    query_feat = cnn_encoder(params, query_data)                      # (b, h', w', c) NHWC
    n_sets = len(support_data_list)
    s_per = support_data_list[0].shape[0]
    for sd in support_data_list:
        assert sd.shape[0] == s_per, "fused path assumes equal-size support sets"
    # TODO(synk): unequal-size support sets would need per-set metric-layer calls.
    support_all = jnp.concatenate(tuple(support_data_list), axis=0)   # (s_total, 3, H, W)
    support_feat = cnn_encoder(params, support_all)                   # (s_total, h', w', c)
    scores, local_scores = tl_module_forward(params, query_feat, support_feat, n_sets)
    # Kept only for API fidelity with the PyTorch module (skip if NCHW is not consumed).
    query_feature = jnp.transpose(query_feat, (0, 3, 1, 2))
    return query_feature, scores, local_scores


# ----------------------------------------------------------------------------
# Deterministic parameter init (mirrors init_weights(init_type='normal')).
# ----------------------------------------------------------------------------
def init_params(key, c=64, cin=3):
    ks = list(jax.random.split(key, 16))
    it = iter(ks)

    def nrm(shape, std=0.02, mean=0.0):
        return mean + std * jax.random.normal(next(it), shape, jnp.float32)

    p = {}
    chans = [(cin, c), (c, c), (c, c), (c, c)]
    for i, (ci, co) in enumerate(chans):
        p[f'conv{i}_w'] = nrm((co, ci, 3, 3))
        p[f'bn{i}_g'] = nrm((co,), mean=1.0)
        p[f'bn{i}_b'] = jnp.zeros((co,), jnp.float32)
        p[f'bn{i}_m'] = jnp.zeros((co,), jnp.float32)
        p[f'bn{i}_v'] = jnp.ones((co,), jnp.float32)

    p['W_conv_w'] = nrm((c, c, 1, 1))
    p['W_bn_g'] = nrm((c,), mean=1.0)
    p['W_bn_b'] = jnp.zeros((c,), jnp.float32)
    p['W_bn_m'] = jnp.zeros((c,), jnp.float32)
    p['W_bn_v'] = jnp.ones((c,), jnp.float32)

    c16 = c // 16
    p['psi_w1'] = nrm((c16, c))
    p['psi_b1'] = jnp.zeros((c16,), jnp.float32)
    p['psi_w2'] = nrm((1, c16))
    p['psi_b2'] = jnp.zeros((1,), jnp.float32)
    return p


if __name__ == "__main__":
    root = jax.random.PRNGKey(0)
    k_param, k_query, k_sup = jax.random.split(root, 3)

    params = init_params(k_param)

    b, s = 2, 2                        # batch of queries, 2 support images per set
    query_images = jax.random.normal(k_query, (b, 3, 16, 16), jnp.float32)
    support_sets = tuple(
        jax.random.normal(k, (s, 3, 16, 16), jnp.float32)
        for k in jax.random.split(k_sup, 2))   # 2 support sets, fused into one launch

    fwd = jax.jit(tlnet_forward)
    query_feature, scores, local_scores = fwd(params, query_images, support_sets)
    jax.block_until_ready((query_feature, scores, local_scores))

    assert query_feature.shape == (b, 64, 4, 4)
    assert scores.shape == (b, s * len(support_sets))
    assert local_scores.shape == (b, s * len(support_sets), 16)
    assert bool(jnp.all(jnp.isfinite(scores)))
    assert bool(jnp.all(jnp.isfinite(local_scores)))
    print("KERNEL_OK")
</pallas_src>

<mosaic_0001>
module attributes {stable_mosaic.version = 11 : i64} {
  func.func @_support_prep_kernel(%arg0: i32, %arg1: memref<64x64xf32, #tpu.memory_space<vmem>>, %arg2: memref<64x64xbf16, #tpu.memory_space<vmem>>, %arg3: memref<1x64xf32, #tpu.memory_space<vmem>>, %arg4: memref<64x64xbf16, #tpu.memory_space<vmem>>, %arg5: memref<64x64xbf16, #tpu.memory_space<vmem>>) attributes {dimension_semantics = [#tpu.dimension_semantics<arbitrary>], iteration_bounds = array<i64: 1>, scalar_prefetch = 0 : i64, scratch_operands = 0 : i64, tpu.core_type = #tpu.core_type<tc>, window_params = [{pipeline_mode = #tpu.pipeline_mode<synchronous>, transform_indices = @transform_0, window_bounds = array<i64: 64, 64>}, {pipeline_mode = #tpu.pipeline_mode<synchronous>, transform_indices = @transform_1, window_bounds = array<i64: 64, 64>}, {pipeline_mode = #tpu.pipeline_mode<synchronous>, transform_indices = @transform_2, window_bounds = array<i64: 1, 64>}, {pipeline_mode = #tpu.pipeline_mode<synchronous>, transform_indices = @transform_3, window_bounds = array<i64: 64, 64>}, {pipeline_mode = #tpu.pipeline_mode<synchronous>, transform_indices = @transform_4, window_bounds = array<i64: 64, 64>}]} {
    %c0 = arith.constant 0 : index
    %c0_0 = arith.constant 0 : index
    %0 = vector.load %arg1[%c0, %c0_0] : memref<64x64xf32, #tpu.memory_space<vmem>>, vector<64x64xf32>
    %1 = arith.truncf %0 : vector<64x64xf32> to vector<64x64xbf16>
    %c0_1 = arith.constant 0 : index
    %c0_2 = arith.constant 0 : index
    %2 = vector.load %arg2[%c0_1, %c0_2] : memref<64x64xbf16, #tpu.memory_space<vmem>>, vector<64x64xbf16>
    %cst = arith.constant dense<0.000000e+00> : vector<64x64xf32>
    %3 = tpu.matmul %1, %2, %cst {dimension_numbers = #tpu.dot_dimension_numbers<[1], [0], [0], [1], [0, 0, 1, 1], [], []>} : vector<64x64xbf16>, vector<64x64xbf16>, vector<64x64xf32> -> vector<64x64xf32>
    %c0_3 = arith.constant 0 : index
    %c0_4 = arith.constant 0 : index
    %4 = vector.load %arg3[%c0_3, %c0_4] : memref<1x64xf32, #tpu.memory_space<vmem>>, vector<1x64xf32>
    %5 = vector.broadcast %4 : vector<1x64xf32> to vector<64x64xf32>
    %6 = arith.addf %3, %5 : vector<64x64xf32>
    %cst_5 = arith.constant 0.000000e+00 : f32
    %7 = vector.broadcast %cst_5 : f32 to vector<64x64xf32>
    %8 = arith.cmpf oge, %6, %7 : vector<64x64xf32>
    %cst_6 = arith.constant 2.000000e-01 : f32
    %9 = vector.broadcast %cst_6 : f32 to vector<64x64xf32>
    %10 = arith.mulf %9, %6 : vector<64x64xf32>
    %11 = arith.select %8, %6, %10 : vector<64x64xi1>, vector<64x64xf32>
    %12 = arith.mulf %11, %11 : vector<64x64xf32>
    %cst_7 = arith.constant dense<0.000000e+00> : vector<64xf32>
    %13 = vector.multi_reduction <add>, %12, %cst_7 [1] : vector<64x64xf32> to vector<64xf32>
    %14 = vector.shape_cast %13 : vector<64xf32> to vector<64x1xf32>
    %cst_8 = arith.constant 1.000000e-24 : f32
    %15 = vector.broadcast %cst_8 : f32 to vector<64x1xf32>
    %16 = arith.maximumf %14, %15 : vector<64x1xf32>
    %17 = math.rsqrt %16 : vector<64x1xf32>
    %18 = vector.broadcast %17 : vector<64x1xf32> to vector<64x64xf32>
    %19 = arith.mulf %11, %18 : vector<64x64xf32>
    %20 = arith.truncf %19 : vector<64x64xf32> to vector<64x64xbf16>
    %c0_9 = arith.constant 0 : index
    %c0_10 = arith.constant 0 : index
    %21 = vector.load %arg4[%c0_9, %c0_10] : memref<64x64xbf16, #tpu.memory_space<vmem>>, vector<64x64xbf16>
    tpu.vector_store %arg4[%c0_9, %c0_10], %20 {strides = array<i32>} : memref<64x64xbf16, #tpu.memory_space<vmem>>, vector<64x64xbf16>,
    %22 = arith.mulf %0, %0 : vector<64x64xf32>
    %cst_11 = arith.constant dense<0.000000e+00> : vector<64xf32>
    %23 = vector.multi_reduction <add>, %22, %cst_11 [1] : vector<64x64xf32> to vector<64xf32>
    %24 = vector.shape_cast %23 : vector<64xf32> to vector<64x1xf32>
    %cst_12 = arith.constant 1.000000e-24 : f32
    %25 = vector.broadcast %cst_12 : f32 to vector<64x1xf32>
    %26 = arith.maximumf %24, %25 : vector<64x1xf32>
    %27 = math.rsqrt %26 : vector<64x1xf32>
    %28 = vector.broadcast %27 : vector<64x1xf32> to vector<64x64xf32>
    %29 = arith.mulf %0, %28 : vector<64x64xf32>
    %30 = arith.truncf %29 : vector<64x64xf32> to vector<64x64xbf16>
    %c0_13 = arith.constant 0 : index
    %c0_14 = arith.constant 0 : index
    %31 = vector.load %arg5[%c0_13, %c0_14] : memref<64x64xbf16, #tpu.memory_space<vmem>>, vector<64x64xbf16>
    tpu.vector_store %arg5[%c0_13, %c0_14], %30 {strides = array<i32>} : memref<64x64xbf16, #tpu.memory_space<vmem>>, vector<64x64xbf16>,
    return
  }
  func.func @transform_0(%arg0: i32) -> (i32, i32) {
    %c0_i32 = arith.constant 0 : i32
    %c0_i32_0 = arith.constant 0 : i32
    %c0_i32_1 = arith.constant 0 : i32
    return %c0_i32, %c0_i32_0 : i32, i32
  }
  func.func @transform_1(%arg0: i32) -> (i32, i32) {
    %c0_i32 = arith.constant 0 : i32
    %c0_i32_0 = arith.constant 0 : i32
    %c0_i32_1 = arith.constant 0 : i32
    return %c0_i32, %c0_i32_0 : i32, i32
  }
  func.func @transform_2(%arg0: i32) -> (i32, i32) {
    %c0_i32 = arith.constant 0 : i32
    %c0_i32_0 = arith.constant 0 : i32
    %c0_i32_1 = arith.constant 0 : i32
    return %c0_i32, %c0_i32_0 : i32, i32
  }
  func.func @transform_3(%arg0: i32) -> (i32, i32) {
    %c0_i32 = arith.constant 0 : i32
    %c0_i32_0 = arith.constant 0 : i32
    %c0_i32_1 = arith.constant 0 : i32
    return %c0_i32, %c0_i32_0 : i32, i32
  }
  func.func @transform_4(%arg0: i32) -> (i32, i32) {
    %c0_i32 = arith.constant 0 : i32
    %c0_i32_0 = arith.constant 0 : i32
    %c0_i32_1 = arith.constant 0 : i32
    return %c0_i32, %c0_i32_0 : i32, i32
  }
}

module attributes {stable_mosaic.version = 11 : i64} {
  func.func @_tl_main_kernel(%arg0: i32, %arg1: memref<128x64xbf16, #tpu.memory_space<vmem>>, %arg2: memref<64x256xbf16, #tpu.memory_space<vmem>>, %arg3: memref<128x256xbf16, #tpu.memory_space<vmem>>, %arg4: memref<1x128xf32, #tpu.memory_space<vmem>>, %arg5: memref<1x128xf32, #tpu.memory_space<vmem>>, %arg6: memref<1x128xf32, #tpu.memory_space<vmem>>, %arg7: memref<1xf32, #tpu.memory_space<smem>>, %arg8: memref<128x8xbf16, #tpu.memory_space<vmem>>, %arg9: memref<128x8xbf16, #tpu.memory_space<vmem>>, %arg10: memref<128x8xf32, #tpu.memory_space<vmem>>, %arg11: memref<128x8xf32, #tpu.memory_space<vmem>>) attributes {dimension_semantics = [#tpu.dimension_semantics<parallel>], iteration_bounds = array<i64: 1>, scalar_prefetch = 0 : i64, scratch_operands = 0 : i64, tpu.core_type = #tpu.core_type<tc>, window_params = [{transform_indices = @transform_0, window_bounds = array<i64: 128, 64>}, {pipeline_mode = #tpu.pipeline_mode<synchronous>, transform_indices = @transform_1, window_bounds = array<i64: 64, 256>}, {pipeline_mode = #tpu.pipeline_mode<synchronous>, transform_indices = @transform_2, window_bounds = array<i64: 128, 256>}, {pipeline_mode = #tpu.pipeline_mode<synchronous>, transform_indices = @transform_3, window_bounds = array<i64: 1, 128>}, {pipeline_mode = #tpu.pipeline_mode<synchronous>, transform_indices = @transform_4, window_bounds = array<i64: 1, 128>}, {pipeline_mode = #tpu.pipeline_mode<synchronous>, transform_indices = @transform_5, window_bounds = array<i64: 1, 128>}, {transform_indices = @transform_6, window_bounds = array<i64: 1>}, {pipeline_mode = #tpu.pipeline_mode<synchronous>, transform_indices = @transform_7, window_bounds = array<i64: 128, 8>}, {pipeline_mode = #tpu.pipeline_mode<synchronous>, transform_indices = @transform_8, window_bounds = array<i64: 128, 8>}, {transform_indices = @transform_9, window_bounds = array<i64: 128, 8>}, {transform_indices = @transform_10, window_bounds = array<i64: 128, 8>}]} {
    %c0 = arith.constant 0 : index
    %c0_0 = arith.constant 0 : index
    %0 = vector.load %arg1[%c0, %c0_0] : memref<128x64xbf16, #tpu.memory_space<vmem>>, vector<128x64xbf16>
    %1 = arith.extf %0 : vector<128x64xbf16> to vector<128x64xf32>
    %2 = arith.mulf %1, %1 : vector<128x64xf32>
    %cst = arith.constant dense<0.000000e+00> : vector<128xf32>
    %3 = vector.multi_reduction <add>, %2, %cst [1] : vector<128x64xf32> to vector<128xf32>
    %4 = vector.shape_cast %3 : vector<128xf32> to vector<128x1xf32>
    %cst_1 = arith.constant 1.000000e-24 : f32
    %5 = vector.broadcast %cst_1 : f32 to vector<128x1xf32>
    %6 = arith.maximumf %4, %5 : vector<128x1xf32>
    %7 = math.rsqrt %6 : vector<128x1xf32>
    %c0_2 = arith.constant 0 : index
    %c0_3 = arith.constant 0 : index
    %8 = vector.load %arg2[%c0_2, %c0_3] : memref<64x256xbf16, #tpu.memory_space<vmem>>, vector<64x256xbf16>
    %cst_4 = arith.constant dense<0.000000e+00> : vector<128x256xf32>
    %9 = tpu.matmul %0, %8, %cst_4 {dimension_numbers = #tpu.dot_dimension_numbers<[1], [0], [0], [1], [0, 0, 1, 1], [], []>} : vector<128x64xbf16>, vector<64x256xbf16>, vector<128x256xf32> -> vector<128x256xf32>
    %10 = vector.extract_strided_slice %9 {offsets = [0, 0], sizes = [128, 128], strides = [1, 1]} : vector<128x256xf32> to vector<128x128xf32>
    %11 = vector.extract_strided_slice %9 {offsets = [0, 128], sizes = [128, 128], strides = [1, 1]} : vector<128x256xf32> to vector<128x128xf32>
    %c0_5 = arith.constant 0 : index
    %c0_6 = arith.constant 0 : index
    %12 = vector.load %arg4[%c0_5, %c0_6] : memref<1x128xf32, #tpu.memory_space<vmem>>, vector<1x128xf32>
    %13 = vector.broadcast %12 : vector<1x128xf32> to vector<128x128xf32>
    %14 = arith.addf %11, %13 : vector<128x128xf32>
    %cst_7 = arith.constant 0.000000e+00 : f32
    %15 = vector.broadcast %cst_7 : f32 to vector<128x128xf32>
    %16 = arith.cmpf oge, %14, %15 : vector<128x128xf32>
    %cst_8 = arith.constant 2.000000e-01 : f32
    %17 = vector.broadcast %cst_8 : f32 to vector<128x128xf32>
    %18 = arith.mulf %17, %14 : vector<128x128xf32>
    %19 = arith.select %16, %14, %18 : vector<128x128xi1>, vector<128x128xf32>
    %20 = arith.mulf %19, %19 : vector<128x128xf32>
    %cst_9 = arith.constant dense<0.000000e+00> : vector<128xf32>
    %21 = vector.multi_reduction <add>, %20, %cst_9 [1] : vector<128x128xf32> to vector<128xf32>
    %22 = vector.shape_cast %21 : vector<128xf32> to vector<128x1xf32>
    %cst_10 = arith.constant 1.000000e-24 : f32
    %23 = vector.broadcast %cst_10 : f32 to vector<128x1xf32>
    %24 = arith.maximumf %22, %23 : vector<128x1xf32>
    %25 = math.rsqrt %24 : vector<128x1xf32>
    %26 = vector.broadcast %25 : vector<128x1xf32> to vector<128x128xf32>
    %27 = arith.mulf %19, %26 : vector<128x128xf32>
    %28 = arith.truncf %27 : vector<128x128xf32> to vector<128x128xbf16>
    %c0_11 = arith.constant 0 : index
    %c0_12 = arith.constant 0 : index
    %29 = vector.load %arg3[%c0_11, %c0_12] : memref<128x256xbf16, #tpu.memory_space<vmem>>, vector<128x256xbf16>
    %cst_13 = arith.constant dense<0.000000e+00> : vector<128x256xf32>
    %30 = tpu.matmul %28, %29, %cst_13 {dimension_numbers = #tpu.dot_dimension_numbers<[1], [0], [0], [1], [0, 0, 1, 1], [], []>} : vector<128x128xbf16>, vector<128x256xbf16>, vector<128x256xf32> -> vector<128x256xf32>
    %31 = vector.extract_strided_slice %30 {offsets = [0, 0], sizes = [128, 128], strides = [1, 1]} : vector<128x256xf32> to vector<128x128xf32>
    %32 = vector.extract_strided_slice %30 {offsets = [0, 128], sizes = [128, 128], strides = [1, 1]} : vector<128x256xf32> to vector<128x128xf32>
    %c0_14 = arith.constant 0 : index
    %c0_15 = arith.constant 0 : index
    %33 = vector.load %arg5[%c0_14, %c0_15] : memref<1x128xf32, #tpu.memory_space<vmem>>, vector<1x128xf32>
    %34 = vector.broadcast %33 : vector<1x128xf32> to vector<128x128xf32>
    %35 = arith.addf %32, %34 : vector<128x128xf32>
    %cst_16 = arith.constant 0.000000e+00 : f32
    %36 = vector.broadcast %cst_16 : f32 to vector<128x128xf32>
    %37 = arith.cmpf oge, %35, %36 : vector<128x128xf32>
    %cst_17 = arith.constant 2.000000e-01 : f32
    %38 = vector.broadcast %cst_17 : f32 to vector<128x128xf32>
    %39 = arith.mulf %38, %35 : vector<128x128xf32>
    %40 = arith.select %37, %35, %39 : vector<128x128xi1>, vector<128x128xf32>
    %c0_18 = arith.constant 0 : index
    %c0_19 = arith.constant 0 : index
    %41 = vector.load %arg6[%c0_18, %c0_19] : memref<1x128xf32, #tpu.memory_space<vmem>>, vector<1x128xf32>
    %42 = vector.broadcast %41 : vector<1x128xf32> to vector<128x128xf32>
    %43 = arith.mulf %40, %42 : vector<128x128xf32>
    %cst_20 = arith.constant dense<0.000000e+00> : vector<128xf32>
    %44 = vector.multi_reduction <add>, %43, %cst_20 [1] : vector<128x128xf32> to vector<128xf32>
    %45 = vector.shape_cast %44 : vector<128xf32> to vector<128x1xf32>
    %c0_21 = arith.constant 0 : index
    %46 = memref.load %arg7[%c0_21] : memref<1xf32, #tpu.memory_space<smem>>
    %47 = vector.broadcast %46 : f32 to vector<128x1xf32>
    %48 = arith.addf %45, %47 : vector<128x1xf32>
    %49 = arith.negf %48 : vector<128x1xf32>
    %50 = math.exp %49 : vector<128x1xf32>
    %cst_22 = arith.constant 1.000000e+00 : f32
    %51 = vector.broadcast %cst_22 : f32 to vector<128x1xf32>
    %52 = arith.addf %51, %50 : vector<128x1xf32>
    %53 = arith.divf %51, %52 : vector<128x1xf32>
    %cst_23 = arith.constant 3.000000e-01 : f32
    %54 = vector.broadcast %cst_23 : f32 to vector<128x1xf32>
    %55 = arith.mulf %53, %54 : vector<128x1xf32>
    %cst_24 = arith.constant 5.000000e-01 : f32
    %56 = vector.broadcast %cst_24 : f32 to vector<128x1xf32>
    %57 = arith.addf %55, %56 : vector<128x1xf32>
    %58 = vector.broadcast %57 : vector<128x1xf32> to vector<128x128xf32>
    %59 = arith.subf %31, %58 : vector<128x128xf32>
    %cst_25 = arith.constant 5.000000e+01 : f32
    %60 = vector.broadcast %cst_25 : f32 to vector<128x128xf32>
    %61 = arith.mulf %60, %59 : vector<128x128xf32>
    %62 = arith.negf %61 : vector<128x128xf32>
    %63 = math.exp %62 : vector<128x128xf32>
    %cst_26 = arith.constant 1.000000e+00 : f32
    %64 = vector.broadcast %cst_26 : f32 to vector<128x128xf32>
    %65 = arith.addf %64, %63 : vector<128x128xf32>
    %66 = arith.divf %64, %65 : vector<128x128xf32>
    %67 = arith.mulf %66, %10 : vector<128x128xf32>
    %68 = arith.truncf %67 : vector<128x128xf32> to vector<128x128xbf16>
    %c0_27 = arith.constant 0 : index
    %c0_28 = arith.constant 0 : index
    %69 = vector.load %arg8[%c0_27, %c0_28] : memref<128x8xbf16, #tpu.memory_space<vmem>>, vector<128x8xbf16>
    %cst_29 = arith.constant dense<0.000000e+00> : vector<128x8xf32>
    %70 = tpu.matmul %68, %69, %cst_29 {dimension_numbers = #tpu.dot_dimension_numbers<[1], [0], [0], [1], [0, 0, 1, 1], [], []>} : vector<128x128xbf16>, vector<128x8xbf16>, vector<128x8xf32> -> vector<128x8xf32>
    %71 = arith.truncf %66 : vector<128x128xf32> to vector<128x128xbf16>
    %c0_30 = arith.constant 0 : index
    %c0_31 = arith.constant 0 : index
    %72 = vector.load %arg9[%c0_30, %c0_31] : memref<128x8xbf16, #tpu.memory_space<vmem>>, vector<128x8xbf16>
    %cst_32 = arith.constant dense<0.000000e+00> : vector<128x8xf32>
    %73 = tpu.matmul %71, %72, %cst_32 {dimension_numbers = #tpu.dot_dimension_numbers<[1], [0], [0], [1], [0, 0, 1, 1], [], []>} : vector<128x128xbf16>, vector<128x8xbf16>, vector<128x8xf32> -> vector<128x8xf32>
    %74 = vector.broadcast %7 : vector<128x1xf32> to vector<128x8xf32>
    %75 = arith.mulf %70, %74 : vector<128x8xf32>
    %c0_33 = arith.constant 0 : index
    %c0_34 = arith.constant 0 : index
    %76 = vector.load %arg10[%c0_33, %c0_34] : memref<128x8xf32, #tpu.memory_space<vmem>>, vector<128x8xf32>
    tpu.vector_store %arg10[%c0_33, %c0_34], %75 {strides = array<i32>} : memref<128x8xf32, #tpu.memory_space<vmem>>, vector<128x8xf32>,
    %c0_35 = arith.constant 0 : index
    %c0_36 = arith.constant 0 : index
    %77 = vector.load %arg11[%c0_35, %c0_36] : memref<128x8xf32, #tpu.memory_space<vmem>>, vector<128x8xf32>
    tpu.vector_store %arg11[%c0_35, %c0_36], %73 {strides = array<i32>} : memref<128x8xf32, #tpu.memory_space<vmem>>, vector<128x8xf32>,
    return
  }
  func.func @transform_0(%arg0: i32) -> (i32, i32) {
    %c0_i32 = arith.constant 0 : i32
    %c0_i32_0 = arith.constant 0 : i32
    return %arg0, %c0_i32 : i32, i32
  }
  func.func @transform_1(%arg0: i32) -> (i32, i32) {
    %c0_i32 = arith.constant 0 : i32
    %c0_i32_0 = arith.constant 0 : i32
    %c0_i32_1 = arith.constant 0 : i32
    return %c0_i32, %c0_i32_0 : i32, i32
  }
  func.func @transform_2(%arg0: i32) -> (i32, i32) {
    %c0_i32 = arith.constant 0 : i32
    %c0_i32_0 = arith.constant 0 : i32
    %c0_i32_1 = arith.constant 0 : i32
    return %c0_i32, %c0_i32_0 : i32, i32
  }
  func.func @transform_3(%arg0: i32) -> (i32, i32) {
    %c0_i32 = arith.constant 0 : i32
    %c0_i32_0 = arith.constant 0 : i32
    %c0_i32_1 = arith.constant 0 : i32
    return %c0_i32, %c0_i32_0 : i32, i32
  }
  func.func @transform_4(%arg0: i32) -> (i32, i32) {
    %c0_i32 = arith.constant 0 : i32
    %c0_i32_0 = arith.constant 0 : i32
    %c0_i32_1 = arith.constant 0 : i32
    return %c0_i32, %c0_i32_0 : i32, i32
  }
  func.func @transform_5(%arg0: i32) -> (i32, i32) {
    %c0_i32 = arith.constant 0 : i32
    %c0_i32_0 = arith.constant 0 : i32
    %c0_i32_1 = arith.constant 0 : i32
    return %c0_i32, %c0_i32_0 : i32, i32
  }
  func.func @transform_6(%arg0: i32) -> i32 {
    %c0_i32 = arith.constant 0 : i32
    %c0_i32_0 = arith.constant 0 : i32
    return %c0_i32 : i32
  }
  func.func @transform_7(%arg0: i32) -> (i32, i32) {
    %c0_i32 = arith.constant 0 : i32
    %c0_i32_0 = arith.constant 0 : i32
    %c0_i32_1 = arith.constant 0 : i32
    return %c0_i32, %c0_i32_0 : i32, i32
  }
  func.func @transform_8(%arg0: i32) -> (i32, i32) {
    %c0_i32 = arith.constant 0 : i32
    %c0_i32_0 = arith.constant 0 : i32
    %c0_i32_1 = arith.constant 0 : i32
    return %c0_i32, %c0_i32_0 : i32, i32
  }
  func.func @transform_9(%arg0: i32) -> (i32, i32) {
    %c0_i32 = arith.constant 0 : i32
    %c0_i32_0 = arith.constant 0 : i32
    return %arg0, %c0_i32 : i32, i32
  }
  func.func @transform_10(%arg0: i32) -> (i32, i32) {
    %c0_i32 = arith.constant 0 : i32
    %c0_i32_0 = arith.constant 0 : i32
    return %arg0, %c0_i32 : i32, i32
  }
}

</mosaic_0001>

<bundles_post_ra>
// kernel: tlnet_forward.2
= control target key start
LH: loop header
LB: loop body
LE: loop exit
PB: predicated region body
PF: predicated region fallthrough
CT: control target
= control target key end

     0   :  { %vm68_vm0 = vcmask 523264   ;;  %vm258_vm1 = vcmask 519168   ;;  %s705_s1 = inlined_call_operand.vmem [shape: bf16[64,64], index: 1, kind: input, shape index: {}]   ;;  %s706_s0 = inlined_call_operand.vmem [shape: f32[64,64], index: 0, kind: input, shape index: {}]   ;;  %s707_s4 = inlined_call_operand.vmem [shape: bf16[64,64], index: 4, kind: output, shape index: {1}]   ;;  %s708_s2 = inlined_call_operand.vmem [shape: f32[1,64], index: 2, kind: input, shape index: {}]   ;;  %s709_s3 = inlined_call_operand.vmem [shape: bf16[64,64], index: 3, kind: output, shape index: {0}]  }
   0x1   :  { %v444_v0 = vld [vmem:[%s705_s1] sm:$0xff]   ;;  %v445_v1 = vld [vmem:[%s705_s1 + $0x8] sm:$0xff]   ;;  %v446_v2 = vld [vmem:[%s705_s1 + $0x10] sm:$0xff]  }
   0x2   :  { %420 = vmatprep.subr.bf16.mxu0 %v444_v0  ;;  %436 = vmatprep.subr.bf16.mxu1 %v444_v0  ;;  %v17_v3 = vld [vmem:[%s706_s0] sm:$0xff]  ;;  %v18_v4 = vld [vmem:[%s706_s0 + $0x8] sm:$0xff]  ;;  %v447_v13 = vld [vmem:[%s705_s1 + $0x18] sm:$0xff]  }
   0x3   :  { %421 = vmatpush3.bf16.msra.mxu0 %v444_v0  ;;  %440 = vmatpush3.bf16.msra.mxu1 %v444_v0  ;;  %v523_v5 = vld [vmem:[%s706_s0 + $0x20] sm:$0xff]  ;;  %v25_v6 = vpack.c.bf16 %v18_v4, %v17_v3  ;;  %v528_v7 = vld [vmem:[%s706_s0 + $0x28] sm:$0xff]  ;;  %v268_v8 = vmul.f32 %v18_v4, %v18_v4  ;;  %v267_v9 = vmul.f32 %v17_v3, %v17_v3  ;;  %v542_v14 = vld [vmem:[%s706_s0 + $0x10] sm:$0xff] }
   0x4   :  { %422 = vmatprep.subr.bf16.mxu0 %v445_v1  ;;  %437 = vmatprep.subr.bf16.mxu1 %v445_v1  ;;  %v27_v10 = vpack.c.bf16 %v528_v7, %v523_v5  ;;  %v547_v15 = vld [vmem:[%s706_s0 + $0x18] sm:$0xff]  ;;  %v552_v16 = vld [vmem:[%s706_s0 + $0x30] sm:$0xff]  ;;  %v269_v21 = vmul.f32 %v542_v14, %v542_v14  ;;  %v272_v24 = vmul.f32 %v528_v7, %v528_v7  ;;  %v371_v38 = vld [vmem:[%s708_s2] ss:$0 sm:$0xff] }
   0x5   :  { %v278_v11 = vsel %vm68_vm0, %v268_v8, 0.0  ;;  %v275_v12 = vsel %vm68_vm0, %v267_v9, 0.0  ;;  %428 = vmatprep.mubr.msk.bf16.mxu0 %vm68_vm0, %v25_v6  ;;  %v557_v17 = vld [vmem:[%s706_s0 + $0x38] sm:$0xff]  ;;  %v26_v18 = vpack.c.bf16 %v547_v15, %v542_v14  ;;  %v270_v20 = vmul.f32 %v547_v15, %v547_v15 }
   0x6   :  { %432 = vmatprep.mubr.msk.bf16.mxu1 %vm68_vm0, %v27_v10  ;;  %279 = vadd.xlane.f32.xlu1 %v278_v11  ;;  %v28_v19 = vpack.c.bf16 %v557_v17, %v552_v16  ;;  %v281_v23 = vsel %vm68_vm0, %v269_v21, 0.0  ;;  %v271_v25 = vmul.f32 %v523_v5, %v523_v5  ;;  %v290_v26 = vsel %vm68_vm0, %v272_v24, 0.0 }
   0x7   :  { %423 = vmatpush3.bf16.msra.mxu0 %v445_v1  ;;  %441 = vmatpush3.bf16.msra.mxu1 %v445_v1  ;;  %v284_v22 = vsel %vm68_vm0, %v270_v20, 0.0 }
   0x8   :  { %424 = vmatprep.subr.bf16.mxu0 %v446_v2  ;;  %438 = vmatprep.subr.bf16.mxu1 %v446_v2  ;;  %v287_v27 = vsel %vm68_vm0, %v271_v25, 0.0 }
   0x9   :  { %276 = vadd.xlane.f32.xlu0 %v275_v12 }
   0xa   :  { %285 = vadd.xlane.f32.xlu1 %v284_v22 }
   0xb   :  { %425 = vmatpush3.bf16.msra.mxu0 %v446_v2  ;;  %442 = vmatpush3.bf16.msra.mxu1 %v446_v2 }
   0xc   :  { %426 = vmatprep.subr.bf16.mxu0 %v447_v13  ;;  %439 = vmatprep.subr.bf16.mxu1 %v447_v13 }
   0xd   :  { %282 = vadd.xlane.f32.xlu0 %v281_v23 }
   0xe   :  { %291 = vadd.xlane.f32.xlu1 %v290_v26 }
   0xf   :  { %427 = vmatpush3.bf16.msra.mxu0 %v447_v13  ;;  %443 = vmatpush3.bf16.msra.mxu1 %v447_v13 }
  0x11   :  { %288 = vadd.xlane.f32.xlu0 %v287_v27 }
  0x12   :  { %429 = vmatmul.mubr.msk.bf16.vlgmr.msra.gmra.mrb[0].mxu0 %vm68_vm0, %v26_v18  ;;  %433 = vmatmul.mubr.msk.bf16.vlgmr.msra.gmra.mrb[0].mxu1 %vm68_vm0, %v28_v19 }
  0x93   :  { %v280_v28 = vpop.xlane.xlu1 %279 }
  0x94   :  { %v300_v30 = vmax.f32 %v280_v28, 1e-24 }
  0x96   :  { %v277_v29 = vpop.xlane.xlu0 %276  ;;  %448 = vrsqrt.f32 %v300_v30 }
  0x97   :  { %v299_v31 = vmax.f32 %v277_v29, 1e-24  ;;  %v286_v23 = vpop.xlane.xlu1 %285 }
  0x98   :  { %v302_v25 = vmax.f32 %v286_v23, 1e-24 }
  0x99   :  { %450 = vrsqrt.f32 %v299_v31  ;;  %v274_v31 = vmul.f32 %v557_v17, %v557_v17 }
  0x9a   :  { %v283_v24 = vpop.xlane.xlu0 %282  ;;  %452 = vrsqrt.f32 %v302_v25 }
  0x9b   :  { %v301_v26 = vmax.f32 %v283_v24, 1e-24 }
  0x9d   :  { %454 = vrsqrt.f32 %v301_v26 }
  0xa0   :  { %v449_v32 = vpop.eup %448 }
  0xa1   :  { %v316_v34 = vmul.f32 %v449_v32, %v18_v4  ;;  %v273_v32 = vmul.f32 %v552_v16, %v552_v16 }
  0xa3   :  { %v451_v33 = vpop.eup %450  ;;  %v405_v36 = vpack.c.bf16 %v316_v34, %v316_v34  ;;  %v289_v34 = vpop.xlane.xlu0 %288 }
  0xa4   :  { %v315_v35 = vmul.f32 %v451_v33, %v17_v3  ;;  %v292_v33 = vpop.xlane.xlu1 %291 }
  0xa5   :  { %356 = vst.msk [vmem:[%s707_s4 + $0x4] sm:$0xf] %vm258_vm1, %v405_v36 }
  0xa6   :  { %v404_v37 = vpack.c.bf16 %v315_v35, %v315_v35 }
  0xa8   :  { %355 = vst.msk [vmem:[%s707_s4] sm:$0xf] %vm258_vm1, %v404_v37  ;;  %v304_v37 = vmax.f32 %v292_v33, 1e-24 }
  0xaa   :  { %456 = vrsqrt.f32 %v304_v37 }
  0xe5   :  { %v430_v39 = vpop.f32.mrb[0].mxu0  ;;  %v434_v40 = vpop.f32.mrb[0].mxu1 }
  0xe6   :  { %v124_v41 = vadd.f32 %v430_v39, %v371_v38  ;;  %v140_v42 = vadd.f32 %v434_v40, %v371_v38  ;;  %v131_v43 = vpop.f32.mrb[1].mxu1  ;;  %v115_v44 = vpop.f32.mrb[1].mxu0  ;;  %v296_v39 = vsel %vm68_vm0, %v274_v31, 0.0  ;;  %v293_v40 = vsel %vm68_vm0, %v273_v32, 0.0 }
  0xe7   :  { %v132_v45 = vadd.f32 %v371_v38, %v131_v43  ;;  %v116_v46 = vadd.f32 %v371_v38, %v115_v44  ;;  %v431_v47 = vpop.f32.mrb[2].mxu0  ;;  %v435_v48 = vpop.f32.mrb[2].mxu1 }
  0xe8   :  { %vm148_vm2 = vcmp.ge.f32.partialorder %v124_v41, 0.0  ;;  %v156_v49 = vmul.f32 0.2, %v124_v41  ;;  %vm152_vm3 = vcmp.ge.f32.partialorder %v140_v42, 0.0  ;;  %v160_v50 = vmul.f32 0.2, %v140_v42 }
  0xe9   :  { %v158_v51 = vmul.f32 0.2, %v132_v45  ;;  %vm146_vm4 = vcmp.ge.f32.partialorder %v116_v46, 0.0  ;;  %v154_v52 = vmul.f32 0.2, %v116_v46  ;;  %v127_v53 = vadd.f32 %v431_v47, %v371_v38  ;;  %v118_v55 = vpop.f32.mrb[3].mxu0 }
  0xea   :  { %v143_v54 = vadd.f32 %v435_v48, %v371_v38  ;;  %v134_v56 = vpop.f32.mrb[3].mxu1  ;;  %v588_v57 = vsel %vm152_vm3, %v140_v42, %v160_v50  ;;  %v590_v58 = vsel %vm148_vm2, %v124_v41, %v156_v49  ;;  %v119_v59 = vadd.f32 %v371_v38, %v118_v55  ;;  %v453_v41 = vpop.eup %452 }
  0xeb   :  { %v135_v60 = vadd.f32 %v371_v38, %v134_v56  ;;  %v176_v61 = vmul.f32 %v588_v57, %v588_v57  ;;  %v172_v62 = vmul.f32 %v590_v58, %v590_v58  ;;  %vm149_vm5 = vcmp.ge.f32.partialorder %v127_v53, 0.0  ;;  %v455_v42 = vpop.eup %454 }
  0xec   :  { %v157_v63 = vmul.f32 0.2, %v127_v53  ;;  %vm153_vm6 = vcmp.ge.f32.partialorder %v143_v54, 0.0  ;;  %v161_v0 = vmul.f32 0.2, %v143_v54  ;;  %vm150_vm7 = vcmp.ge.f32.partialorder %v132_v45, 0.0  ;;  %v457_v47 = vpop.eup %456 }
  0xed   :  { %v155_v1 = vmul.f32 0.2, %v119_v59  ;;  %v159_v2 = vmul.f32 0.2, %v135_v60  ;;  %v196_v3 = vsel %vm68_vm0, %v176_v61, 0.0  ;;  %v184_v4 = vsel %vm68_vm0, %v172_v62, 0.0 }
  0xee   :  { %v598_v6 = vsel %vm149_vm5, %v127_v53, %v157_v63  ;;  %v601_v8 = vsel %vm146_vm4, %v116_v46, %v154_v52  ;;  %vm151_vm8 = vcmp.ge.f32.partialorder %v135_v60, 0.0  ;;  %197 = vadd.xlane.f32.xlu0 %v196_v3  ;;  %185 = vadd.xlane.f32.xlu1 %v184_v4  ;;  %v607_v11 = vsel %vm153_vm6, %v143_v54, %v161_v0 }
  0xef   :  { %v173_v9 = vmul.f32 %v598_v6, %v598_v6  ;;  %v170_v10 = vmul.f32 %v601_v8, %v601_v8  ;;  %vm147_vm9 = vcmp.ge.f32.partialorder %v119_v59, 0.0  ;;  %v609_v12 = vsel %vm150_vm7, %v132_v45, %v158_v51 }
  0xf0   :  { %v177_v13 = vmul.f32 %v607_v11, %v607_v11  ;;  %v174_v20 = vmul.f32 %v609_v12, %v609_v12  ;;  %v617_v21 = vsel %vm151_vm8, %v135_v60, %v159_v2  ;;  %v619_v22 = vsel %vm147_vm9, %v119_v59, %v155_v1 }
  0xf1   :  { %v187_v18 = vsel %vm68_vm0, %v173_v9, 0.0  ;;  %v178_v19 = vsel %vm68_vm0, %v170_v10, 0.0  ;;  %v175_v27 = vmul.f32 %v617_v21, %v617_v21  ;;  %v171_v30 = vmul.f32 %v619_v22, %v619_v22 }
  0xf2   :  { %188 = vadd.xlane.f32.xlu1 %v187_v18  ;;  %179 = vadd.xlane.f32.xlu0 %v178_v19  ;;  %v199_v28 = vsel %vm68_vm0, %v177_v13, 0.0  ;;  %v190_v29 = vsel %vm68_vm0, %v174_v20, 0.0  ;;  %v303_v38 = vmax.f32 %v289_v34, 1e-24  ;;  %v318_v43 = vmul.f32 %v453_v41, %v547_v15 }
  0xf3   :  { %v193_v35 = vsel %vm68_vm0, %v175_v27, 0.0  ;;  %v181_v36 = vsel %vm68_vm0, %v171_v30, 0.0  ;;  %v317_v44 = vmul.f32 %v455_v42, %v542_v14  ;;  %v320_v49 = vmul.f32 %v457_v47, %v528_v7 }
  0xf4   :  { %458 = vrsqrt.f32 %v303_v38  ;;  %v407_v45 = vpack.c.bf16 %v318_v43, %v318_v43 }
  0xf5   :  { %v406_v46 = vpack.c.bf16 %v317_v44, %v317_v44  ;;  %v409_v50 = vpack.c.bf16 %v320_v49, %v320_v49 }
  0xf6   :  { %200 = vadd.xlane.f32.xlu1 %v199_v28  ;;  %191 = vadd.xlane.f32.xlu0 %v190_v29  ;;  %358 = vst.msk [vmem:[%s707_s4 + $0xc] sm:$0xf] %vm258_vm1, %v407_v45 }
  0xf7   :  { %357 = vst.msk [vmem:[%s707_s4 + $0x8] sm:$0xf] %vm258_vm1, %v406_v46  ;;  %360 = vst.msk [vmem:[%s707_s4 + $0x14] sm:$0xf] %vm258_vm1, %v409_v50 }
  0xfa   :  { %194 = vadd.xlane.f32.xlu1 %v193_v35  ;;  %182 = vadd.xlane.f32.xlu0 %v181_v36 }
  0xfe   :  { %297 = vadd.xlane.f32.xlu1 %v296_v39  ;;  %294 = vadd.xlane.f32.xlu0 %v293_v40  ;;  %v459_v48 = vpop.eup %458 }
  0xff   :  { %v319_v15 = vmul.f32 %v459_v48, %v523_v5 }
 0x101   :  { %v408_v14 = vpack.c.bf16 %v319_v15, %v319_v15 }
 0x103   :  { %359 = vst.msk [vmem:[%s707_s4 + $0x10] sm:$0xf] %vm258_vm1, %v408_v14 }
 0x17b   :  { %v198_v51 = vpop.xlane.xlu0 %197  ;;  %v186_v52 = vpop.xlane.xlu1 %185 }
 0x17c   :  { %v208_v53 = vmax.f32 %v198_v51, 1e-24  ;;  %v204_v54 = vmax.f32 %v186_v52, 1e-24 }
 0x17e   :  { %460 = vrsqrt.f32 %v208_v53 }
 0x17f   :  { %462 = vrsqrt.f32 %v204_v54  ;;  %v189_v7 = vpop.xlane.xlu1 %188  ;;  %v180_v5 = vpop.xlane.xlu0 %179 }
 0x180   :  { %v205_v55 = vmax.f32 %v189_v7, 1e-24  ;;  %v202_v56 = vmax.f32 %v180_v5, 1e-24 }
 0x182   :  { %464 = vrsqrt.f32 %v205_v55 }
 0x183   :  { %466 = vrsqrt.f32 %v202_v56  ;;  %v201_v59 = vpop.xlane.xlu1 %200  ;;  %v192_v60 = vpop.xlane.xlu0 %191 }
 0x184   :  { %v209_v61 = vmax.f32 %v201_v59, 1e-24  ;;  %v206_v62 = vmax.f32 %v192_v60, 1e-24 }
 0x186   :  { %468 = vrsqrt.f32 %v209_v61 }
 0x187   :  { %470 = vrsqrt.f32 %v206_v62  ;;  %v195_v63 = vpop.xlane.xlu1 %194  ;;  %v183_v0 = vpop.xlane.xlu0 %182 }
 0x188   :  { %v461_v1 = vpop.eup %460  ;;  %v207_v2 = vmax.f32 %v195_v63, 1e-24  ;;  %v203_v3 = vmax.f32 %v183_v0, 1e-24 }
 0x189   :  { %v463_v4 = vpop.eup %462  ;;  %v224_v9 = vmul.f32 %v461_v1, %v588_v57 }
 0x18a   :  { %v220_v10 = vmul.f32 %v463_v4, %v590_v58  ;;  %472 = vrsqrt.f32 %v207_v2 }
 0x18b   :  { %v402_v13 = vpack.c.bf16 %v224_v9, %v224_v9  ;;  %474 = vrsqrt.f32 %v203_v3  ;;  %v298_v18 = vpop.xlane.xlu1 %297  ;;  %v295_v19 = vpop.xlane.xlu0 %294 }
 0x18c   :  { %v465_v20 = vpop.eup %464  ;;  %v398_v23 = vpack.c.bf16 %v220_v10, %v220_v10  ;;  %v306_v24 = vmax.f32 %v298_v18, 1e-24  ;;  %v305_v25 = vmax.f32 %v295_v19, 1e-24 }
 0x18d   :  { %v467_v26 = vpop.eup %466  ;;  %265 = vst.msk [vmem:[%s709_s3 + $0x18] sm:$0xf] %vm258_vm1, %v402_v13  ;;  %v221_v27 = vmul.f32 %v465_v20, %v598_v6 }
 0x18e   :  { %261 = vst.msk [vmem:[%s709_s3 + $0x8] sm:$0xf] %vm258_vm1, %v398_v23  ;;  %v218_v57 = vmul.f32 %v467_v26, %v601_v8  ;;  %476 = vrsqrt.f32 %v306_v24 }
 0x18f   :  { %v399_v58 = vpack.c.bf16 %v221_v27, %v221_v27  ;;  %478 = vrsqrt.f32 %v305_v25 }
 0x190   :  { %v469_v28 = vpop.eup %468  ;;  %v396_v29 = vpack.c.bf16 %v218_v57, %v218_v57 }
 0x191   :  { %v471_v30 = vpop.eup %470  ;;  %262 = vst.msk [vmem:[%s709_s3 + $0xc] sm:$0xf] %vm258_vm1, %v399_v58  ;;  %v225_v6 = vmul.f32 %v469_v28, %v607_v11 }
 0x192   :  { %259 = vst.msk [vmem:[%s709_s3] sm:$0xf] %vm258_vm1, %v396_v29  ;;  %v222_v8 = vmul.f32 %v471_v30, %v609_v12 }
 0x193   :  { %v403_v31 = vpack.c.bf16 %v225_v6, %v225_v6 }
 0x194   :  { %v473_v32 = vpop.eup %472  ;;  %v400_v33 = vpack.c.bf16 %v222_v8, %v222_v8 }
 0x195   :  { %v475_v34 = vpop.eup %474  ;;  %266 = vst.msk [vmem:[%s709_s3 + $0x1c] sm:$0xf] %vm258_vm1, %v403_v31  ;;  %v223_v35 = vmul.f32 %v473_v32, %v617_v21 }
 0x196   :  { %263 = vst.msk [vmem:[%s709_s3 + $0x10] sm:$0xf] %vm258_vm1, %v400_v33  ;;  %v219_v11 = vmul.f32 %v475_v34, %v619_v22 }
 0x197   :  { %v401_v36 = vpack.c.bf16 %v223_v35, %v223_v35 }
 0x198   :  { %v477_v12 = vpop.eup %476  ;;  %v397_v37 = vpack.c.bf16 %v219_v11, %v219_v11 }
 0x199   :  { %v479_v38 = vpop.eup %478  ;;  %264 = vst.msk [vmem:[%s709_s3 + $0x14] sm:$0xf] %vm258_vm1, %v401_v36  ;;  %v322_v39 = vmul.f32 %v477_v12, %v557_v17 }
 0x19a   :  { %260 = vst.msk [vmem:[%s709_s3 + $0x4] sm:$0xf] %vm258_vm1, %v397_v37  ;;  %v321_v21 = vmul.f32 %v479_v38, %v552_v16 }
 0x19b   :  { %v411_v40 = vpack.c.bf16 %v322_v39, %v322_v39 }
 0x19c   :  { %v410_v22 = vpack.c.bf16 %v321_v21, %v321_v21 }
 0x19d   :  { %362 = vst.msk [vmem:[%s707_s4 + $0x1c] sm:$0xf] %vm258_vm1, %v411_v40 }
 0x19e   :  { %361 = vst.msk [vmem:[%s707_s4 + $0x18] sm:$0xf] %vm258_vm1, %v410_v22 }

// kernel: tlnet_forward.3
= control target key start
LH: loop header
LB: loop body
LE: loop exit
PB: predicated region body
PF: predicated region fallthrough
CT: control target
= control target key end

     0   :  { %v2057_v1 = vmov 0   ;;  %vm84_vm0 = vcmask 523264   ;;  %s2779_s1 = inlined_call_operand.vmem [shape: bf16[64,256], index: 1, kind: input, shape index: {}]   ;;  %s2780_s0 = inlined_call_operand.vmem [shape: bf16[128,64], index: 0, kind: input, shape index: {}]   ;;  %s2781_s2 = inlined_call_operand.vmem [shape: bf16[128,256], index: 2, kind: input, shape index: {}]   ;;  %s2782_s3 = inlined_call_operand.vmem [shape: f32[1,128], index: 3, kind: input, shape index: {}]   ;;  %s2783_s4 = inlined_call_operand.vmem [shape: f32[1,128], index: 4, kind: input, shape index: {}]   ;;  %s2784_s5 = inlined_call_operand.vmem [shape: f32[1,128], index: 5, kind: input, shape index: {}]   ;;  %s2785_s7 = inlined_call_operand.vmem [shape: bf16[128,8], index: 7, kind: input, shape index: {}]   ;;  %s2786_s8 = inlined_call_operand.vmem [shape: bf16[128,8], index: 8, kind: input, shape index: {}]   ;;  %s2787_s6 = inlined_call_operand.<no memory space> [shape: f32[1], index: 6, kind: input, shape index: {}]   ;;  %s2788_s9 = inlined_call_operand.vmem [shape: f32[128,8], index: 9, kind: output, shape index: {0}]   ;;  %s2789_s10 = inlined_call_operand.vmem [shape: f32[128,8], index: 10, kind: output, shape index: {1}]  }
   0x1   :  { %v1789_v0 = vld [vmem:[%s2779_s1 + $0x4] ss:$8 sps:$4 sm:$0xff]   ;;  %309 = vmatprep.mubr.bf16.mxu0 %v2057_v1  ;;  %693 = vmatprep.mubr.bf16.mxu1 %v2057_v1  ;;  %v1791_v2 = vld [vmem:[%s2779_s1] ss:$8 sps:$4 sm:$0xff]   ;;  %v1792_v3 = vld [vmem:[%s2779_s1 + $0x14] ss:$8 sps:$4 sm:$0xff]  }
   0x2   :  { %277 = vmatprep.subr.bf16.mxu0 %v1789_v0  ;;  %v1794_v4 = vld [vmem:[%s2779_s1 + $0x10] ss:$8 sps:$4 sm:$0xff]   ;;  %v1795_v5 = vld [vmem:[%s2779_s1 + $0x24] ss:$8 sps:$4 sm:$0xff]   ;;  %v1797_v6 = vld [vmem:[%s2779_s1 + $0x20] ss:$8 sps:$4 sm:$0xff]  }
   0x3   :  { %278 = vmatpush1.bf16.msra.mxu0 %v1791_v2  ;;  %v1798_v7 = vld [vmem:[%s2779_s1 + $0x34] ss:$8 sps:$4 sm:$0xff]   ;;  %v1800_v8 = vld [vmem:[%s2779_s1 + $0x30] ss:$8 sps:$4 sm:$0xff]   ;;  %v36_v9 = vld [vmem:[%s2780_s0] sm:$0xff]  }
   0x4   :  { %279 = vmatprep.subr.bf16.mxu0 %v1792_v3  ;;  %v38_v10 = vld [vmem:[%s2780_s0 + $0x8] sm:$0xff]   ;;  %v40_v11 = vld [vmem:[%s2780_s0 + $0x10] sm:$0xff]   ;;  %v42_v12 = vld [vmem:[%s2780_s0 + $0x18] sm:$0xff]  }
   0x5   :  { %v44_v13 = vld [vmem:[%s2780_s0 + $0x20] sm:$0xff]   ;;  %v46_v14 = vld [vmem:[%s2780_s0 + $0x28] sm:$0xff]   ;;  %v48_v15 = vld [vmem:[%s2780_s0 + $0x30] sm:$0xff]  }
   0x6   :  { %v50_v16 = vld [vmem:[%s2780_s0 + $0x38] sm:$0xff]   ;;  %v1809_v17 = vld [vmem:[%s2781_s2 + $0x4] ss:$8 sps:$4 sm:$0xff]   ;;  %v1811_v18 = vld [vmem:[%s2781_s2] ss:$8 sps:$4 sm:$0xff]  }
   0x7   :  { %280 = vmatpush1.bf16.msra.mxu0 %v1794_v4  ;;  %661 = vmatprep.subr.bf16.mxu1 %v1809_v17  ;;  %v1812_v19 = vld [vmem:[%s2781_s2 + $0x14] ss:$8 sps:$4 sm:$0xff]   ;;  %v1814_v20 = vld [vmem:[%s2781_s2 + $0x10] ss:$8 sps:$4 sm:$0xff]   ;;  %v1815_v21 = vld [vmem:[%s2781_s2 + $0x24] ss:$8 sps:$4 sm:$0xff]  }
   0x8   :  { %281 = vmatprep.subr.bf16.mxu0 %v1795_v5  ;;  %662 = vmatpush1.bf16.msra.mxu1 %v1811_v18  ;;  %v1817_v22 = vld [vmem:[%s2781_s2 + $0x20] ss:$8 sps:$4 sm:$0xff]   ;;  %v1818_v57 = vld [vmem:[%s2781_s2 + $0x34] ss:$8 sps:$4 sm:$0xff]   ;;  %v1820_v59 = vld [vmem:[%s2781_s2 + $0x30] ss:$8 sps:$4 sm:$0xff]  }
   0x9   :  { %663 = vmatprep.subr.bf16.mxu1 %v1812_v19  ;;  %v2199_v23 = vld [vmem:[%s2782_s3] ss:$0 sm:$0xff]  ;;  %v1821_v3 = vld [vmem:[%s2781_s2 + $0x44] ss:$8 sps:$4 sm:$0xff]  }
   0xa   :  { %v1823_v5 = vld [vmem:[%s2781_s2 + $0x40] ss:$8 sps:$4 sm:$0xff]   ;;  %v1827_v19 = vld [vmem:[%s2781_s2 + $0x64] ss:$8 sps:$4 sm:$0xff]  }
   0xb   :  { %282 = vmatpush1.bf16.msra.mxu0 %v1797_v6 }
   0xc   :  { %283 = vmatprep.subr.bf16.mxu0 %v1798_v7  ;;  %664 = vmatpush1.bf16.msra.mxu1 %v1814_v20 }
   0xd   :  { %665 = vmatprep.subr.bf16.mxu1 %v1815_v21  ;;  %v1829_v21 = vld [vmem:[%s2781_s2 + $0x60] ss:$8 sps:$4 sm:$0xff]  }
   0xf   :  { %284 = vmatpush1.bf16.msra.mxu0 %v1800_v8 }
  0x10   :  { %666 = vmatpush1.bf16.msra.mxu1 %v1817_v22 }
  0x11   :  { %667 = vmatprep.subr.bf16.mxu1 %v1818_v57 }
  0x12   :  { %1601 = vmatmul.mubr.msk.bf16.vlgmr.msra.gmra.mrb[0].mxu0 %vm84_vm0, %v36_v9 }
  0x13   :  { %319 = vmatprep.mubr.bf16.mxu0 %v2057_v1 }
  0x14   :  { %668 = vmatpush1.bf16.msra.mxu1 %v1820_v59 }
  0x15   :  { %669 = vmatprep.subr.bf16.mxu1 %v1821_v3 }
  0x18   :  { %670 = vmatpush1.bf16.msra.mxu1 %v1823_v5 }
  0x1a   :  { %1602 = vmatmul.mubr.msk.bf16.gmra.mrb[4].mxu0 %vm84_vm0, %v38_v10  ;;  %v1824_v10 = vld [vmem:[%s2781_s2 + $0x54] ss:$8 sps:$4 sm:$0xff]  }
  0x1b   :  { %329 = vmatprep.mubr.bf16.mxu0 %v2057_v1  ;;  %671 = vmatprep.subr.bf16.mxu1 %v1824_v10 }
  0x22   :  { %1603 = vmatmul.mubr.msk.bf16.gmra.mrb[8].mxu0 %vm84_vm0, %v40_v11 }
  0x23   :  { %339 = vmatprep.mubr.bf16.mxu0 %v2057_v1 }
  0x2a   :  { %1604 = vmatmul.mubr.msk.bf16.gmra.mrb[12].mxu0 %vm84_vm0, %v42_v12  ;;  %v1826_v12 = vld [vmem:[%s2781_s2 + $0x50] ss:$8 sps:$4 sm:$0xff]  }
  0x2b   :  { %349 = vmatprep.mubr.bf16.mxu0 %v2057_v1  ;;  %672 = vmatpush1.bf16.msra.mxu1 %v1826_v12 }
  0x2c   :  { %673 = vmatprep.subr.bf16.mxu1 %v1827_v19 }
  0x2f   :  { %674 = vmatpush1.bf16.msra.mxu1 %v1829_v21 }
  0x32   :  { %1605 = vmatmul.mubr.msk.bf16.gmra.mrb[16].mxu0 %vm84_vm0, %v44_v13 }
  0x33   :  { %359 = vmatprep.mubr.bf16.mxu0 %v2057_v1 }
  0x3a   :  { %1606 = vmatmul.mubr.msk.bf16.gmra.mrb[20].mxu0 %vm84_vm0, %v46_v14 }
  0x3b   :  { %369 = vmatprep.mubr.bf16.mxu0 %v2057_v1 }
  0x42   :  { %1607 = vmatmul.mubr.msk.bf16.gmra.mrb[24].mxu0 %vm84_vm0, %v48_v15 }
  0x43   :  { %379 = vmatprep.mubr.bf16.mxu0 %v2057_v1 }
  0x4a   :  { %1608 = vmatmul.mubr.msk.bf16.gmra.mrb[28].mxu0 %vm84_vm0, %v50_v16 }
  0xe5   :  { %v2201_v24 = vpop.f32.mrb[0].mxu0 }
  0xe6   :  { %v313_v25 = vpop.f32.mrb[1].mxu0 }
  0xe7   :  { %v397_v26 = vadd.f32 %v2199_v23, %v313_v25  ;;  %v2204_v27 = vpop.f32.mrb[2].mxu0 }
  0xe8   :  { %v317_v28 = vpop.f32.mrb[3].mxu0 }
  0xe9   :  { %v429_v29 = vmul.f32 0.2, %v397_v26  ;;  %v398_v30 = vadd.f32 %v2199_v23, %v317_v28  ;;  %vm413_vm1 = vcmp.ge.f32.partialorder %v397_v26, 0.0 }
  0xeb   :  { %v430_v31 = vmul.f32 0.2, %v398_v30  ;;  %v2207_v32 = vsel %vm413_vm1, %v397_v26, %v429_v29  ;;  %vm414_vm2 = vcmp.ge.f32.partialorder %v398_v30, 0.0  ;;  %v1830_v29 = vld [vmem:[%s2781_s2 + $0x74] ss:$8 sps:$4 sm:$0xff]  }
  0xec   :  { %v461_v33 = vmul.f32 %v2207_v32, %v2207_v32  ;;  %675 = vmatprep.subr.bf16.mxu1 %v1830_v29 }
  0xed   :  { %v2211_v34 = vpop.f32.mrb[4].mxu0  ;;  %v2213_v35 = vsel %vm414_vm2, %v398_v30, %v430_v31  ;;  %v1832_v31 = vld [vmem:[%s2781_s2 + $0x70] ss:$8 sps:$4 sm:$0xff]  }
  0xee   :  { %477 = vadd.xlane.f32.xlu0 %v461_v33  ;;  %v323_v36 = vpop.f32.mrb[5].mxu0  ;;  %v462_v40 = vmul.f32 %v2213_v35, %v2213_v35  ;;  %676 = vmatpush1.bf16.msra.mxu1 %v1832_v31 }
  0xef   :  { %v399_v37 = vadd.f32 %v2199_v23, %v323_v36  ;;  %v2216_v38 = vpop.f32.mrb[6].mxu0 }
  0xf0   :  { %v327_v39 = vpop.f32.mrb[7].mxu0 }
  0xf1   :  { %v431_v41 = vmul.f32 0.2, %v399_v37  ;;  %v400_v42 = vadd.f32 %v2199_v23, %v327_v39  ;;  %vm415_vm3 = vcmp.ge.f32.partialorder %v399_v37, 0.0 }
  0xf2   :  { %479 = vadd.xlane.f32.xlu0 %v462_v40 }
  0xf3   :  { %v432_v43 = vmul.f32 0.2, %v400_v42  ;;  %v2221_v44 = vsel %vm415_vm3, %v399_v37, %v431_v41  ;;  %vm416_vm4 = vcmp.ge.f32.partialorder %v400_v42, 0.0 }
  0xf4   :  { %v463_v45 = vmul.f32 %v2221_v44, %v2221_v44 }
  0xf5   :  { %v2225_v46 = vpop.f32.mrb[8].mxu0  ;;  %v2227_v47 = vsel %vm416_vm4, %v400_v42, %v432_v43 }
  0xf6   :  { %481 = vadd.xlane.f32.xlu1 %v463_v45  ;;  %v333_v48 = vpop.f32.mrb[9].mxu0  ;;  %v464_v52 = vmul.f32 %v2227_v47, %v2227_v47 }
  0xf7   :  { %v401_v49 = vadd.f32 %v2199_v23, %v333_v48  ;;  %v2230_v50 = vpop.f32.mrb[10].mxu0 }
  0xf8   :  { %v337_v51 = vpop.f32.mrb[11].mxu0 }
  0xf9   :  { %v433_v53 = vmul.f32 0.2, %v401_v49  ;;  %v402_v54 = vadd.f32 %v2199_v23, %v337_v51  ;;  %vm417_vm5 = vcmp.ge.f32.partialorder %v401_v49, 0.0 }
  0xfa   :  { %483 = vadd.xlane.f32.xlu1 %v464_v52 }
  0xfb   :  { %v434_v55 = vmul.f32 0.2, %v402_v54  ;;  %v2235_v56 = vsel %vm417_vm5, %v401_v49, %v433_v53  ;;  %vm418_vm6 = vcmp.ge.f32.partialorder %v402_v54, 0.0 }
  0xfc   :  { %v465_v58 = vmul.f32 %v2235_v56, %v2235_v56 }
  0xfd   :  { %v2245_v60 = vpop.f32.mrb[12].mxu0  ;;  %v2247_v61 = vsel %vm418_vm6, %v402_v54, %v434_v55 }
  0xfe   :  { %485 = vadd.xlane.f32.xlu0 %v465_v58  ;;  %v343_v62 = vpop.f32.mrb[13].mxu0  ;;  %v466_v63 = vmul.f32 %v2247_v61, %v2247_v61 }
  0xff   :  { %v403_v0 = vadd.f32 %v2199_v23, %v343_v62  ;;  %v2252_v2 = vpop.f32.mrb[14].mxu0 }
 0x100   :  { %487 = vadd.xlane.f32.xlu1 %v466_v63  ;;  %v347_v4 = vpop.f32.mrb[15].mxu0 }
 0x101   :  { %v435_v6 = vmul.f32 0.2, %v403_v0  ;;  %v404_v7 = vadd.f32 %v2199_v23, %v347_v4  ;;  %vm419_vm7 = vcmp.ge.f32.partialorder %v403_v0, 0.0 }
 0x103   :  { %v436_v8 = vmul.f32 0.2, %v404_v7  ;;  %v2261_v9 = vsel %vm419_vm7, %v403_v0, %v435_v6  ;;  %vm420_vm8 = vcmp.ge.f32.partialorder %v404_v7, 0.0 }
 0x104   :  { %v467_v11 = vmul.f32 %v2261_v9, %v2261_v9 }
 0x105   :  { %v2271_v13 = vpop.f32.mrb[16].mxu0  ;;  %v2273_v14 = vsel %vm420_vm8, %v404_v7, %v436_v8 }
 0x106   :  { %489 = vadd.xlane.f32.xlu0 %v467_v11  ;;  %v353_v15 = vpop.f32.mrb[17].mxu0  ;;  %v468_v16 = vmul.f32 %v2273_v14, %v2273_v14 }
 0x107   :  { %v405_v17 = vadd.f32 %v2199_v23, %v353_v15  ;;  %v2278_v18 = vpop.f32.mrb[18].mxu0 }
 0x108   :  { %491 = vadd.xlane.f32.xlu1 %v468_v16  ;;  %v357_v20 = vpop.f32.mrb[19].mxu0 }
 0x109   :  { %v437_v22 = vmul.f32 0.2, %v405_v17  ;;  %v406_v25 = vadd.f32 %v2199_v23, %v357_v20  ;;  %vm421_vm9 = vcmp.ge.f32.partialorder %v405_v17, 0.0 }
 0x10b   :  { %v438_v26 = vmul.f32 0.2, %v406_v25  ;;  %v2287_v28 = vsel %vm421_vm9, %v405_v17, %v437_v22  ;;  %vm422_vm10 = vcmp.ge.f32.partialorder %v406_v25, 0.0 }
 0x10c   :  { %v469_v30 = vmul.f32 %v2287_v28, %v2287_v28 }
 0x10d   :  { %v2297_v33 = vpop.f32.mrb[20].mxu0  ;;  %v2299_v36 = vsel %vm422_vm10, %v406_v25, %v438_v26 }
 0x10e   :  { %493 = vadd.xlane.f32.xlu0 %v469_v30  ;;  %v363_v37 = vpop.f32.mrb[21].mxu0  ;;  %v470_v39 = vmul.f32 %v2299_v36, %v2299_v36 }
 0x10f   :  { %v407_v40 = vadd.f32 %v2199_v23, %v363_v37  ;;  %v2304_v41 = vpop.f32.mrb[22].mxu0 }
 0x110   :  { %495 = vadd.xlane.f32.xlu1 %v470_v39  ;;  %v367_v42 = vpop.f32.mrb[23].mxu0 }
 0x111   :  { %v439_v43 = vmul.f32 0.2, %v407_v40  ;;  %v408_v45 = vadd.f32 %v2199_v23, %v367_v42  ;;  %vm423_vm11 = vcmp.ge.f32.partialorder %v407_v40, 0.0 }
 0x113   :  { %v440_v48 = vmul.f32 0.2, %v408_v45  ;;  %v2307_v49 = vsel %vm423_vm11, %v407_v40, %v439_v43  ;;  %vm424_vm12 = vcmp.ge.f32.partialorder %v408_v45, 0.0 }
 0x114   :  { %v471_v51 = vmul.f32 %v2307_v49, %v2307_v49 }
 0x115   :  { %v2311_v52 = vpop.f32.mrb[24].mxu0  ;;  %v2313_v53 = vsel %vm424_vm12, %v408_v45, %v440_v48 }
 0x116   :  { %497 = vadd.xlane.f32.xlu0 %v471_v51  ;;  %v373_v54 = vpop.f32.mrb[25].mxu0  ;;  %v472_v55 = vmul.f32 %v2313_v53, %v2313_v53 }
 0x117   :  { %v409_v57 = vadd.f32 %v2199_v23, %v373_v54  ;;  %v2318_v58 = vpop.f32.mrb[26].mxu0 }
 0x118   :  { %499 = vadd.xlane.f32.xlu1 %v472_v55  ;;  %v377_v59 = vpop.f32.mrb[27].mxu0 }
 0x119   :  { %v441_v62 = vmul.f32 0.2, %v409_v57  ;;  %v410_v63 = vadd.f32 %v2199_v23, %v377_v59  ;;  %vm425_vm13 = vcmp.ge.f32.partialorder %v409_v57, 0.0 }
 0x11b   :  { %v442_v0 = vmul.f32 0.2, %v410_v63  ;;  %v2321_v3 = vsel %vm425_vm13, %v409_v57, %v441_v62  ;;  %vm426_vm14 = vcmp.ge.f32.partialorder %v410_v63, 0.0 }
 0x11c   :  { %v473_v4 = vmul.f32 %v2321_v3, %v2321_v3 }
 0x11d   :  { %v2325_v5 = vpop.f32.mrb[28].mxu0  ;;  %v2327_v6 = vsel %vm426_vm14, %v410_v63, %v442_v0 }
 0x11e   :  { %501 = vadd.xlane.f32.xlu0 %v473_v4  ;;  %v383_v7 = vpop.f32.mrb[29].mxu0  ;;  %v474_v8 = vmul.f32 %v2327_v6, %v2327_v6 }
 0x11f   :  { %v411_v10 = vadd.f32 %v2199_v23, %v383_v7  ;;  %v2332_v11 = vpop.f32.mrb[30].mxu0 }
 0x120   :  { %503 = vadd.xlane.f32.xlu1 %v474_v8  ;;  %v387_v12 = vpop.f32.mrb[31].mxu0 }
 0x121   :  { %v443_v15 = vmul.f32 0.2, %v411_v10  ;;  %v412_v16 = vadd.f32 %v2199_v23, %v387_v12  ;;  %vm427_vm15 = vcmp.ge.f32.partialorder %v411_v10, 0.0 }
 0x123   :  { %v444_v17 = vmul.f32 0.2, %v412_v16  ;;  %v2335_v19 = vsel %vm427_vm15, %v411_v10, %v443_v15  ;;  %vm428_vm1 = vcmp.ge.f32.partialorder %v412_v16, 0.0 }
 0x124   :  { %v475_v20 = vmul.f32 %v2335_v19, %v2335_v19 }
 0x125   :  { %v2339_v21 = vsel %vm428_vm1, %v412_v16, %v444_v17 }
 0x126   :  { %505 = vadd.xlane.f32.xlu0 %v475_v20  ;;  %v476_v22 = vmul.f32 %v2339_v21, %v2339_v21 }
 0x128   :  { %507 = vadd.xlane.f32.xlu1 %v476_v22 }
 0x17b   :  { %v478_v25 = vpop.xlane.xlu0 %477 }
 0x17c   :  { %v509_v26 = vmax.f32 %v478_v25, 1e-24 }
 0x17e   :  { %1857 = vrsqrt.f32 %v509_v26 }
 0x17f   :  { %v480_v29 = vpop.xlane.xlu0 %479 }
 0x180   :  { %v510_v23 = vmax.f32 %v480_v29, 1e-24 }
 0x182   :  { %1859 = vrsqrt.f32 %v510_v23 }
 0x183   :  { %v482_v30 = vpop.xlane.xlu1 %481 }
 0x184   :  { %v511_v31 = vmax.f32 %v482_v30, 1e-24 }
 0x186   :  { %1861 = vrsqrt.f32 %v511_v31 }
 0x187   :  { %v484_v37 = vpop.xlane.xlu1 %483 }
 0x188   :  { %v512_v39 = vmax.f32 %v484_v37, 1e-24  ;;  %v1858_v40 = vpop.eup %1857 }
 0x189   :  { %v541_v51 = vmul.f32 %v1858_v40, %v2207_v32 }
 0x18a   :  { %1863 = vrsqrt.f32 %v512_v39 }
 0x18b   :  { %v486_v42 = vpop.xlane.xlu0 %485 }
 0x18c   :  { %v1860_v43 = vpop.eup %1859  ;;  %v513_v45 = vmax.f32 %v486_v42, 1e-24 }
 0x18d   :  { %v488_v48 = vpop.xlane.xlu1 %487  ;;  %v542_v54 = vmul.f32 %v1860_v43, %v2213_v35 }
 0x18e   :  { %v514_v55 = vmax.f32 %v488_v48, 1e-24  ;;  %1865 = vrsqrt.f32 %v513_v45 }
 0x18f   :  { %v557_v57 = vpack.c.bf16 %v542_v54, %v541_v51 }
 0x190   :  { %1867 = vrsqrt.f32 %v514_v55  ;;  %v1862_v59 = vpop.eup %1861 }
 0x191   :  { %694 = vmatmul.mubr.bf16.vlgmr.msra.gmra.mrb[0].mxu1 %v557_v57  ;;  %v543_v7 = vmul.f32 %v1862_v59, %v2221_v44 }
 0x192   :  { %703 = vmatprep.mubr.bf16.mxu1 %v2057_v1 }
 0x193   :  { %v490_v62 = vpop.xlane.xlu0 %489 }
 0x194   :  { %v1864_v63 = vpop.eup %1863  ;;  %v515_v0 = vmax.f32 %v490_v62, 1e-24 }
 0x195   :  { %v492_v4 = vpop.xlane.xlu1 %491  ;;  %v544_v8 = vmul.f32 %v1864_v63, %v2227_v47 }
 0x196   :  { %v516_v10 = vmax.f32 %v492_v4, 1e-24  ;;  %1869 = vrsqrt.f32 %v515_v0 }
 0x197   :  { %v558_v32 = vpack.c.bf16 %v544_v8, %v543_v7 }
 0x198   :  { %1871 = vrsqrt.f32 %v516_v10  ;;  %v1866_v35 = vpop.eup %1865 }
 0x199   :  { %704 = vmatmul.mubr.bf16.gmra.mrb[4].mxu1 %v558_v32  ;;  %v545_v22 = vmul.f32 %v1866_v35, %v2235_v56 }
 0x19a   :  { %v1868_v12 = vpop.eup %1867  ;;  %713 = vmatprep.mubr.bf16.mxu1 %v2057_v1 }
 0x19b   :  { %v494_v15 = vpop.xlane.xlu0 %493  ;;  %v546_v16 = vmul.f32 %v1868_v12, %v2247_v61 }
 0x19c   :  { %v517_v17 = vmax.f32 %v494_v15, 1e-24 }
 0x19d   :  { %v496_v20 = vpop.xlane.xlu1 %495  ;;  %v559_v44 = vpack.c.bf16 %v546_v16, %v545_v22  ;;  %v2369_v16 = vld [vmem:[%s2783_s4] ss:$0 sm:$0xff] }
 0x19e   :  { %v518_v25 = vmax.f32 %v496_v20, 1e-24  ;;  %1873 = vrsqrt.f32 %v517_v17 }
 0x1a0   :  { %1875 = vrsqrt.f32 %v518_v25  ;;  %v1870_v47 = vpop.eup %1869 }
 0x1a1   :  { %714 = vmatmul.mubr.bf16.gmra.mrb[8].mxu1 %v559_v44  ;;  %v547_v61 = vmul.f32 %v1870_v47, %v2261_v9 }
 0x1a2   :  { %v1872_v26 = vpop.eup %1871  ;;  %723 = vmatprep.mubr.bf16.mxu1 %v2057_v1 }
 0x1a3   :  { %v498_v29 = vpop.xlane.xlu0 %497  ;;  %v548_v23 = vmul.f32 %v1872_v26, %v2273_v14 }
 0x1a4   :  { %v519_v30 = vmax.f32 %v498_v29, 1e-24 }
 0x1a5   :  { %v500_v31 = vpop.xlane.xlu1 %499  ;;  %v560_v39 = vpack.c.bf16 %v548_v23, %v547_v61 }
 0x1a6   :  { %v520_v37 = vmax.f32 %v500_v31, 1e-24  ;;  %1877 = vrsqrt.f32 %v519_v30 }
 0x1a8   :  { %1879 = vrsqrt.f32 %v520_v37  ;;  %v1874_v56 = vpop.eup %1873 }
 0x1a9   :  { %724 = vmatmul.mubr.bf16.gmra.mrb[12].mxu1 %v560_v39  ;;  %v549_v14 = vmul.f32 %v1874_v56, %v2287_v28 }
 0x1aa   :  { %v1876_v40 = vpop.eup %1875  ;;  %733 = vmatprep.mubr.bf16.mxu1 %v2057_v1 }
 0x1ab   :  { %v502_v42 = vpop.xlane.xlu0 %501  ;;  %v550_v43 = vmul.f32 %v1876_v40, %v2299_v36 }
 0x1ac   :  { %v521_v45 = vmax.f32 %v502_v42, 1e-24 }
 0x1ad   :  { %v504_v48 = vpop.xlane.xlu1 %503  ;;  %v561_v54 = vpack.c.bf16 %v550_v43, %v549_v14 }
 0x1ae   :  { %v522_v51 = vmax.f32 %v504_v48, 1e-24  ;;  %1881 = vrsqrt.f32 %v521_v45 }
 0x1b0   :  { %1883 = vrsqrt.f32 %v522_v51  ;;  %v1878_v9 = vpop.eup %1877 }
 0x1b1   :  { %734 = vmatmul.mubr.bf16.gmra.mrb[16].mxu1 %v561_v54  ;;  %v551_v36 = vmul.f32 %v1878_v9, %v2307_v49 }
 0x1b2   :  { %v1880_v55 = vpop.eup %1879  ;;  %743 = vmatprep.mubr.bf16.mxu1 %v2057_v1 }
 0x1b3   :  { %v506_v57 = vpop.xlane.xlu0 %505  ;;  %v552_v59 = vmul.f32 %v1880_v55, %v2313_v53 }
 0x1b4   :  { %v523_v62 = vmax.f32 %v506_v57, 1e-24 }
 0x1b5   :  { %v508_v63 = vpop.xlane.xlu1 %507  ;;  %v562_v4 = vpack.c.bf16 %v552_v59, %v551_v36 }
 0x1b6   :  { %v524_v0 = vmax.f32 %v508_v63, 1e-24  ;;  %1885 = vrsqrt.f32 %v523_v62 }
 0x1b8   :  { %1887 = vrsqrt.f32 %v524_v0  ;;  %v1882_v28 = vpop.eup %1881 }
 0x1b9   :  { %744 = vmatmul.mubr.bf16.gmra.mrb[20].mxu1 %v562_v4  ;;  %v553_v10 = vmul.f32 %v1882_v28, %v2321_v3 }
 0x1ba   :  { %v1884_v7 = vpop.eup %1883  ;;  %753 = vmatprep.mubr.bf16.mxu1 %v2057_v1 }
 0x1bb   :  { %v554_v8 = vmul.f32 %v1884_v7, %v2327_v6 }
 0x1bd   :  { %v563_v32 = vpack.c.bf16 %v554_v8, %v553_v10 }
 0x1c0   :  { %v1886_v35 = vpop.eup %1885 }
 0x1c1   :  { %754 = vmatmul.mubr.bf16.gmra.mrb[24].mxu1 %v563_v32  ;;  %v555_v12 = vmul.f32 %v1886_v35, %v2335_v19  ;;  %v2380_v19 = vld [vmem:[%s2784_s5] ss:$0 sm:$0xff] }
 0x1c2   :  { %v1888_v53 = vpop.eup %1887  ;;  %763 = vmatprep.mubr.bf16.mxu1 %v2057_v1 }
 0x1c3   :  { %v556_v49 = vmul.f32 %v1888_v53, %v2339_v21 }
 0x1c5   :  { %v564_v15 = vpack.c.bf16 %v556_v49, %v555_v12 }
 0x1c9   :  { %764 = vmatmul.mubr.bf16.gmra.mrb[28].mxu1 %v564_v15 }
 0x264   :  { %v2371_v6 = vpop.f32.mrb[0].mxu1 }
 0x265   :  { %v697_v3 = vpop.f32.mrb[1].mxu1 }
 0x266   :  { %v781_v17 = vadd.f32 %v2369_v16, %v697_v3  ;;  %v2374_v20 = vpop.f32.mrb[2].mxu1 }
 0x267   :  { %v701_v22 = vpop.f32.mrb[3].mxu1 }
 0x268   :  { %v813_v1 = vmul.f32 0.2, %v781_v17  ;;  %v782_v21 = vadd.f32 %v2369_v16, %v701_v22  ;;  %vm797_vm2 = vcmp.ge.f32.partialorder %v781_v17, 0.0 }
 0x26a   :  { %v814_v25 = vmul.f32 0.2, %v782_v21  ;;  %v829_v44 = vsel %vm797_vm2, %v781_v17, %v813_v1  ;;  %vm798_vm3 = vcmp.ge.f32.partialorder %v782_v21, 0.0 }
 0x26b   :  { %v852_v47 = vmul.f32 %v2380_v19, %v829_v44 }
 0x26c   :  { %v2383_v26 = vpop.f32.mrb[4].mxu1  ;;  %v830_v29 = vsel %vm798_vm3, %v782_v21, %v814_v25 }
 0x26d   :  { %v707_v23 = vpop.f32.mrb[5].mxu1  ;;  %868 = vadd.xlane.f32.xlu0 %v852_v47  ;;  %v853_v30 = vmul.f32 %v2380_v19, %v830_v29 }
 0x26e   :  { %v783_v31 = vadd.f32 %v2369_v16, %v707_v23  ;;  %v2387_v61 = vpop.f32.mrb[6].mxu1 }
 0x26f   :  { %v711_v37 = vpop.f32.mrb[7].mxu1  ;;  %870 = vadd.xlane.f32.xlu1 %v853_v30 }
 0x270   :  { %v815_v39 = vmul.f32 0.2, %v783_v31  ;;  %v784_v56 = vadd.f32 %v2369_v16, %v711_v37  ;;  %vm799_vm4 = vcmp.ge.f32.partialorder %v783_v31, 0.0 }
 0x272   :  { %v816_v40 = vmul.f32 0.2, %v784_v56  ;;  %v831_v42 = vsel %vm799_vm4, %v783_v31, %v815_v39  ;;  %vm800_vm5 = vcmp.ge.f32.partialorder %v784_v56, 0.0 }
 0x273   :  { %v854_v43 = vmul.f32 %v2380_v19, %v831_v42 }
 0x274   :  { %v2391_v45 = vpop.f32.mrb[8].mxu1  ;;  %v832_v48 = vsel %vm800_vm5, %v784_v56, %v816_v40 }
 0x275   :  { %v717_v14 = vpop.f32.mrb[9].mxu1  ;;  %872 = vadd.xlane.f32.xlu0 %v854_v43  ;;  %v855_v51 = vmul.f32 %v2380_v19, %v832_v48 }
 0x276   :  { %v785_v54 = vadd.f32 %v2369_v16, %v717_v14  ;;  %v2395_v9 = vpop.f32.mrb[10].mxu1 }
 0x277   :  { %v721_v55 = vpop.f32.mrb[11].mxu1  ;;  %874 = vadd.xlane.f32.xlu1 %v855_v51 }
 0x278   :  { %v817_v57 = vmul.f32 0.2, %v785_v54  ;;  %v786_v59 = vadd.f32 %v2369_v16, %v721_v55  ;;  %vm801_vm6 = vcmp.ge.f32.partialorder %v785_v54, 0.0 }
 0x27a   :  { %v818_v62 = vmul.f32 0.2, %v786_v59  ;;  %v833_v63 = vsel %vm801_vm6, %v785_v54, %v817_v57  ;;  %vm802_vm7 = vcmp.ge.f32.partialorder %v786_v59, 0.0 }
 0x27b   :  { %v856_v36 = vmul.f32 %v2380_v19, %v833_v63 }
 0x27c   :  { %v2399_v0 = vpop.f32.mrb[12].mxu1  ;;  %v834_v4 = vsel %vm802_vm7, %v786_v59, %v818_v62 }
 0x27d   :  { %v727_v28 = vpop.f32.mrb[13].mxu1  ;;  %876 = vadd.xlane.f32.xlu0 %v856_v36  ;;  %v857_v7 = vmul.f32 %v2380_v19, %v834_v4 }
 0x27e   :  { %v787_v8 = vadd.f32 %v2369_v16, %v727_v28  ;;  %v2403_v10 = vpop.f32.mrb[14].mxu1 }
 0x27f   :  { %v731_v32 = vpop.f32.mrb[15].mxu1  ;;  %878 = vadd.xlane.f32.xlu1 %v857_v7 }
 0x280   :  { %v819_v35 = vmul.f32 0.2, %v787_v8  ;;  %v788_v53 = vadd.f32 %v2369_v16, %v731_v32  ;;  %vm803_vm8 = vcmp.ge.f32.partialorder %v787_v8, 0.0 }
 0x282   :  { %v820_v49 = vmul.f32 0.2, %v788_v53  ;;  %v835_v12 = vsel %vm803_vm8, %v787_v8, %v819_v35  ;;  %vm804_vm9 = vcmp.ge.f32.partialorder %v788_v53, 0.0 }
 0x283   :  { %v858_v15 = vmul.f32 %v2380_v19, %v835_v12 }
 0x284   :  { %v2407_v3 = vpop.f32.mrb[16].mxu1  ;;  %v836_v17 = vsel %vm804_vm9, %v788_v53, %v820_v49 }
 0x285   :  { %v737_v22 = vpop.f32.mrb[17].mxu1  ;;  %880 = vadd.xlane.f32.xlu0 %v858_v15  ;;  %v859_v1 = vmul.f32 %v2380_v19, %v836_v17 }
 0x286   :  { %v789_v21 = vadd.f32 %v2369_v16, %v737_v22  ;;  %v2411_v25 = vpop.f32.mrb[18].mxu1 }
 0x287   :  { %v741_v44 = vpop.f32.mrb[19].mxu1  ;;  %882 = vadd.xlane.f32.xlu1 %v859_v1 }
 0x288   :  { %v821_v47 = vmul.f32 0.2, %v789_v21  ;;  %v790_v29 = vadd.f32 %v2369_v16, %v741_v44  ;;  %vm805_vm10 = vcmp.ge.f32.partialorder %v789_v21, 0.0 }
 0x28a   :  { %v822_v23 = vmul.f32 0.2, %v790_v29  ;;  %v837_v30 = vsel %vm805_vm10, %v789_v21, %v821_v47  ;;  %vm806_vm11 = vcmp.ge.f32.partialorder %v790_v29, 0.0 }
 0x28b   :  { %v860_v31 = vmul.f32 %v2380_v19, %v837_v30 }
 0x28c   :  { %v2415_v37 = vpop.f32.mrb[20].mxu1  ;;  %v838_v39 = vsel %vm806_vm11, %v790_v29, %v822_v23 }
 0x28d   :  { %v747_v56 = vpop.f32.mrb[21].mxu1  ;;  %884 = vadd.xlane.f32.xlu0 %v860_v31  ;;  %v861_v40 = vmul.f32 %v2380_v19, %v838_v39 }
 0x28e   :  { %v791_v42 = vadd.f32 %v2369_v16, %v747_v56  ;;  %v2419_v43 = vpop.f32.mrb[22].mxu1 }
 0x28f   :  { %v751_v48 = vpop.f32.mrb[23].mxu1  ;;  %886 = vadd.xlane.f32.xlu1 %v861_v40  ;;  %v1833_v40 = vld [vmem:[%s2785_s7] sm:$0xff]  }
 0x290   :  { %v823_v14 = vmul.f32 0.2, %v791_v42  ;;  %v792_v51 = vadd.f32 %v2369_v16, %v751_v48  ;;  %vm807_vm12 = vcmp.ge.f32.partialorder %v791_v42, 0.0  ;;  %1708 = vmatprep.subr.bf16.mxu0 %v1833_v40  ;;  %v2455_v48 = vld [vmem:[%s2786_s8] sm:$0xff]  }
 0x291   :  { %1709 = vmatpush3.bf16.msra.mxu0 %v1833_v40  ;;  %1772 = vmatprep.subr.bf16.mxu1 %v2455_v48 }
 0x292   :  { %v824_v54 = vmul.f32 0.2, %v792_v51  ;;  %v839_v55 = vsel %vm807_vm12, %v791_v42, %v823_v14  ;;  %vm808_vm13 = vcmp.ge.f32.partialorder %v792_v51, 0.0  ;;  %v1835_v42 = vld [vmem:[%s2785_s7 + $0x10] sm:$0xff]   ;;  %v1839_v14 = vld [vmem:[%s2785_s7 + $0x20] sm:$0xff]   ;;  %1780 = vmatpush3.bf16.msra.mxu1 %v2455_v48 }
 0x293   :  { %v862_v57 = vmul.f32 %v2380_v19, %v839_v55  ;;  %v2475_v55 = vld [vmem:[%s2786_s8 + $0x10] sm:$0xff]  }
 0x294   :  { %v2423_v59 = vpop.f32.mrb[24].mxu1  ;;  %v840_v62 = vsel %vm808_vm13, %v792_v51, %v824_v54  ;;  %v2465_v51 = vld [vmem:[%s2786_s8 + $0x8] sm:$0xff]  }
 0x295   :  { %v757_v63 = vpop.f32.mrb[25].mxu1  ;;  %888 = vadd.xlane.f32.xlu0 %v862_v57  ;;  %v863_v36 = vmul.f32 %v2380_v19, %v840_v62  ;;  %1773 = vmatprep.subr.bf16.mxu1 %v2465_v51  ;;  %v1840_v54 = vld [vmem:[%s2785_s7 + $0x28] sm:$0xff]   ;;  %v1842_v57 = vld [vmem:[%s2785_s7 + $0x30] sm:$0xff]   ;;  %v2485_v62 = vld [vmem:[%s2786_s8 + $0x18] sm:$0xff]  }
 0x296   :  { %v793_v4 = vadd.f32 %v2369_v16, %v757_v63  ;;  %v2427_v28 = vpop.f32.mrb[26].mxu1  ;;  %1781 = vmatpush3.bf16.msra.mxu1 %v2465_v51  ;;  %v1844_v63 = vld [vmem:[%s2785_s7 + $0x38] sm:$0xff]  }
 0x297   :  { %v761_v7 = vpop.f32.mrb[27].mxu1  ;;  %890 = vadd.xlane.f32.xlu1 %v863_v36  ;;  %1774 = vmatprep.subr.bf16.mxu1 %v2475_v55  ;;  %v2495_v36 = vld [vmem:[%s2786_s8 + $0x20] sm:$0xff]  }
 0x298   :  { %v825_v8 = vmul.f32 0.2, %v793_v4  ;;  %v794_v32 = vadd.f32 %v2369_v16, %v761_v7  ;;  %vm809_vm14 = vcmp.ge.f32.partialorder %v793_v4, 0.0  ;;  %v2510_v7 = vld [vmem:[%s2786_s8 + $0x30] sm:$0xff]  }
 0x29a   :  { %v826_v35 = vmul.f32 0.2, %v794_v32  ;;  %v841_v53 = vsel %vm809_vm14, %v793_v4, %v825_v8  ;;  %vm810_vm15 = vcmp.ge.f32.partialorder %v794_v32, 0.0  ;;  %1782 = vmatpush3.bf16.msra.mxu1 %v2475_v55  ;;  %v2503_v4 = vld [vmem:[%s2786_s8 + $0x28] sm:$0xff]   ;;  %v2517_v8 = vld [vmem:[%s2786_s8 + $0x38] sm:$0xff]  }
 0x29b   :  { %v864_v49 = vmul.f32 %v2380_v19, %v841_v53  ;;  %1775 = vmatprep.subr.bf16.mxu1 %v2485_v62 }
 0x29c   :  { %v2431_v12 = vpop.f32.mrb[28].mxu1  ;;  %v842_v15 = vsel %vm810_vm15, %v794_v32, %v826_v35  ;;  %v2524_v32 = vstv %s2787_s6 }
 0x29d   :  { %892 = vadd.xlane.f32.xlu0 %v864_v49  ;;  %v767_v17 = vpop.f32.mrb[29].mxu1  ;;  %v865_v22 = vmul.f32 %v2380_v19, %v842_v15  ;;  %v2049_v49 = vld [vmem:[%s2780_s0] sm:$0xff]  }
 0x29e   :  { %v795_v1 = vadd.f32 %v2369_v16, %v767_v17  ;;  %v2435_v21 = vpop.f32.mrb[30].mxu1  ;;  %1783 = vmatpush3.bf16.msra.mxu1 %v2485_v62  ;;  %v52_v15 = vunpack.c.l.bf16 %v2049_v49 }
 0x29f   :  { %894 = vadd.xlane.f32.xlu1 %v865_v22  ;;  %v771_v44 = vpop.f32.mrb[31].mxu1  ;;  %1776 = vmatprep.subr.bf16.mxu1 %v2495_v36  ;;  %v53_v22 = vunpack.c.h.bf16 %v2049_v49  ;;  %v2052_v49 = vld [vmem:[%s2780_s0 + $0x18] sm:$0xff]  }
 0x2a0   :  { %v827_v47 = vmul.f32 0.2, %v795_v1  ;;  %v796_v29 = vadd.f32 %v2369_v16, %v771_v44  ;;  %vm811_vm1 = vcmp.ge.f32.partialorder %v795_v1, 0.0  ;;  %v1834_v16 = vld [vmem:[%s2785_s7 + $0x8] sm:$0xff]  }
 0x2a1   :  { %1710 = vmatprep.subr.bf16.mxu0 %v1834_v16 }
 0x2a2   :  { %v828_v23 = vmul.f32 0.2, %v796_v29  ;;  %v843_v30 = vsel %vm811_vm1, %v795_v1, %v827_v47  ;;  %vm812_vm2 = vcmp.ge.f32.partialorder %v796_v29, 0.0  ;;  %1711 = vmatpush3.bf16.msra.mxu0 %v1834_v16  ;;  %1784 = vmatpush3.bf16.msra.mxu1 %v2495_v36  ;;  %v68_v47 = vmul.f32 %v52_v15, %v52_v15 }
 0x2a3   :  { %v866_v31 = vmul.f32 %v2380_v19, %v843_v30  ;;  %1712 = vmatprep.subr.bf16.mxu0 %v1835_v42  ;;  %1777 = vmatprep.subr.bf16.mxu1 %v2503_v4  ;;  %v58_v15 = vunpack.c.l.bf16 %v2052_v49 }
 0x2a4   :  { %v844_v39 = vsel %vm812_vm2, %v796_v29, %v828_v23  ;;  %v69_v29 = vmul.f32 %v53_v22, %v53_v22  ;;  %v85_v30 = vsel %vm84_vm0, %v68_v47, 0.0  ;;  %v2053_v22 = vld [vmem:[%s2780_s0 + $0x20] sm:$0xff]  }
 0x2a5   :  { %896 = vadd.xlane.f32.xlu0 %v866_v31  ;;  %v867_v56 = vmul.f32 %v2380_v19, %v844_v39  ;;  %v1837_v19 = vld [vmem:[%s2785_s7 + $0x18] sm:$0xff]   ;;  %v2050_v31 = vld [vmem:[%s2780_s0 + $0x8] sm:$0xff]  }
 0x2a6   :  { %1713 = vmatpush3.bf16.msra.mxu0 %v1835_v42  ;;  %1785 = vmatpush3.bf16.msra.mxu1 %v2503_v4  ;;  %v54_v39 = vunpack.c.l.bf16 %v2050_v31  ;;  %v55_v16 = vunpack.c.h.bf16 %v2050_v31  ;;  %v74_v31 = vmul.f32 %v58_v15, %v58_v15 }
 0x2a7   :  { %898 = vadd.xlane.f32.xlu1 %v867_v56  ;;  %1714 = vmatprep.subr.bf16.mxu0 %v1837_v19  ;;  %v88_v56 = vsel %vm84_vm0, %v69_v29, 0.0 }
 0x2a8   :  { %1778 = vmatprep.subr.bf16.mxu1 %v2510_v7  ;;  %v70_v40 = vmul.f32 %v54_v39, %v54_v39 }
 0x2a9   :  { %86 = vadd.xlane.f32.xlu0 %v85_v30 }
 0x2aa   :  { %1715 = vmatpush3.bf16.msra.mxu0 %v1837_v19  ;;  %1786 = vmatpush3.bf16.msra.mxu1 %v2510_v7 }
 0x2ab   :  { %1716 = vmatprep.subr.bf16.mxu0 %v1839_v14  ;;  %1779 = vmatprep.subr.bf16.mxu1 %v2517_v8 }
 0x2ac   :  { %89 = vadd.xlane.f32.xlu1 %v88_v56 }
 0x2ae   :  { %1717 = vmatpush3.bf16.msra.mxu0 %v1839_v14  ;;  %1787 = vmatpush3.bf16.msra.mxu1 %v2517_v8  ;;  %v91_v14 = vsel %vm84_vm0, %v70_v40, 0.0 }
 0x2af   :  { %1718 = vmatprep.subr.bf16.mxu0 %v1840_v54  ;;  %92 = vadd.xlane.f32.xlu0 %v91_v14 }
 0x2b2   :  { %1719 = vmatpush3.bf16.msra.mxu0 %v1840_v54  ;;  %v71_v54 = vmul.f32 %v55_v16, %v55_v16  ;;  %v61_v16 = vunpack.c.h.bf16 %v2053_v22 }
 0x2b3   :  { %1720 = vmatprep.subr.bf16.mxu0 %v1842_v57 }
 0x2b4   :  { %v94_v29 = vsel %vm84_vm0, %v71_v54, 0.0  ;;  %v2054_v54 = vld [vmem:[%s2780_s0 + $0x28] sm:$0xff]  }
 0x2b5   :  { %95 = vadd.xlane.f32.xlu1 %v94_v29 }
 0x2b6   :  { %1721 = vmatpush3.bf16.msra.mxu0 %v1842_v57  ;;  %v2051_v57 = vld [vmem:[%s2780_s0 + $0x10] sm:$0xff]  }
 0x2b7   :  { %1722 = vmatprep.subr.bf16.mxu0 %v1844_v63 }
 0x2ba   :  { %1723 = vmatpush3.bf16.msra.mxu0 %v1844_v63  ;;  %v56_v63 = vunpack.c.l.bf16 %v2051_v57 }
 0x2bb   :  { %1740 = vmatprep.subr.bf16.mxu0 %v2455_v48 }
 0x2fa   :  { %v869_v35 = vpop.xlane.xlu0 %868 }
 0x2fb   :  { %v902_v53 = vadd.f32 %v2524_v32, %v869_v35 }
 0x2fc   :  { %v871_v17 = vpop.xlane.xlu1 %870 }
 0x2fd   :  { %v1628_v1 = vmul.f32 -1.442695, %v902_v53  ;;  %v903_v44 = vadd.f32 %v2524_v32, %v871_v17  ;;  %v57_v53 = vunpack.c.h.bf16 %v2051_v57  ;;  %v59_v17 = vunpack.c.h.bf16 %v2052_v49 }
 0x2ff   :  { %1889 = vpow2.f32 %v1628_v1  ;;  %v1629_v23 = vmul.f32 -1.442695, %v903_v44  ;;  %v60_v1 = vunpack.c.l.bf16 %v2053_v22  ;;  %v73_v30 = vmul.f32 %v57_v53, %v57_v53 }
 0x300   :  { %v75_v39 = vmul.f32 %v59_v17, %v59_v17  ;;  %v77_v22 = vmul.f32 %v61_v16, %v61_v16 }
 0x301   :  { %1891 = vpow2.f32 %v1629_v23  ;;  %v72_v23 = vmul.f32 %v56_v63, %v56_v63  ;;  %v76_v14 = vmul.f32 %v60_v1, %v60_v1  ;;  %v62_v63 = vunpack.c.l.bf16 %v2054_v54 }
 0x302   :  { %v873_v42 = vpop.xlane.xlu0 %872  ;;  %v106_v17 = vsel %vm84_vm0, %v75_v39, 0.0 }
 0x303   :  { %v904_v19 = vadd.f32 %v2524_v32, %v873_v42  ;;  %v97_v40 = vsel %vm84_vm0, %v72_v23, 0.0  ;;  %v100_v42 = vsel %vm84_vm0, %v73_v30, 0.0  ;;  %v109_v29 = vsel %vm84_vm0, %v76_v14, 0.0 }
 0x304   :  { %v875_v35 = vpop.xlane.xlu1 %874  ;;  %98 = vadd.xlane.f32.xlu0 %v97_v40  ;;  %101 = vadd.xlane.f32.xlu1 %v100_v42  ;;  %v112_v42 = vsel %vm84_vm0, %v77_v22, 0.0 }
 0x305   :  { %v1630_v44 = vmul.f32 -1.442695, %v904_v19  ;;  %v905_v47 = vadd.f32 %v2524_v32, %v875_v35  ;;  %v103_v19 = vsel %vm84_vm0, %v74_v31, 0.0  ;;  %v78_v31 = vmul.f32 %v62_v63, %v62_v63  ;;  %v2056_v63 = vld [vmem:[%s2780_s0 + $0x38] sm:$0xff]  }
 0x307   :  { %1893 = vpow2.f32 %v1630_v44  ;;  %v1631_v56 = vmul.f32 -1.442695, %v905_v47  ;;  %v63_v44 = vunpack.c.h.bf16 %v2054_v54  ;;  %v115_v14 = vsel %vm84_vm0, %v78_v31, 0.0 }
 0x308   :  { %104 = vadd.xlane.f32.xlu0 %v103_v19  ;;  %107 = vadd.xlane.f32.xlu1 %v106_v17 }
 0x309   :  { %v1890_v57 = vpop.eup %1889  ;;  %1895 = vpow2.f32 %v1631_v56  ;;  %v2055_v56 = vld [vmem:[%s2780_s0 + $0x30] sm:$0xff]  }
 0x30a   :  { %v966_v35 = vadd.f32 1.0, %v1890_v57  ;;  %v877_v53 = vpop.xlane.xlu0 %876  ;;  %v64_v40 = vunpack.c.l.bf16 %v2055_v56  ;;  %v65_v39 = vunpack.c.h.bf16 %v2055_v56  ;;  %v79_v57 = vmul.f32 %v63_v44, %v63_v44 }
 0x30b   :  { %v1892_v49 = vpop.eup %1891  ;;  %v906_v15 = vadd.f32 %v2524_v32, %v877_v53  ;;  %v67_v44 = vunpack.c.h.bf16 %v2056_v63 }
 0x30c   :  { %1897 = vrcp.f32 %v966_v35  ;;  %v967_v1 = vadd.f32 1.0, %v1892_v49  ;;  %v879_v47 = vpop.xlane.xlu1 %878  ;;  %110 = vadd.xlane.f32.xlu0 %v109_v29  ;;  %v80_v54 = vmul.f32 %v64_v40, %v64_v40  ;;  %v66_v35 = vunpack.c.l.bf16 %v2056_v63  ;;  %113 = vadd.xlane.f32.xlu1 %v112_v42 }
 0x30d   :  { %v1632_v23 = vmul.f32 -1.442695, %v906_v15  ;;  %v907_v30 = vadd.f32 %v2524_v32, %v879_v47  ;;  %v81_v15 = vmul.f32 %v65_v39, %v65_v39  ;;  %v118_v22 = vsel %vm84_vm0, %v79_v57, 0.0 }
 0x30e   :  { %1899 = vrcp.f32 %v967_v1  ;;  %v121_v31 = vsel %vm84_vm0, %v80_v54, 0.0  ;;  %v82_v56 = vmul.f32 %v66_v35, %v66_v35  ;;  %v83_v57 = vmul.f32 %v67_v44, %v67_v44 }
 0x30f   :  { %1901 = vpow2.f32 %v1632_v23  ;;  %v1633_v16 = vmul.f32 -1.442695, %v907_v30  ;;  %v124_v39 = vsel %vm84_vm0, %v81_v15, 0.0 }
 0x310   :  { %116 = vadd.xlane.f32.xlu0 %v115_v14  ;;  %119 = vadd.xlane.f32.xlu1 %v118_v22 }
 0x311   :  { %v1894_v19 = vpop.eup %1893  ;;  %1903 = vpow2.f32 %v1633_v16 }
 0x312   :  { %v968_v53 = vadd.f32 1.0, %v1894_v19  ;;  %v881_v49 = vpop.xlane.xlu0 %880 }
 0x313   :  { %v1896_v17 = vpop.eup %1895  ;;  %v908_v1 = vadd.f32 %v2524_v32, %v881_v49  ;;  %v127_v49 = vsel %vm84_vm0, %v82_v56, 0.0 }
 0x314   :  { %1905 = vrcp.f32 %v968_v53  ;;  %v969_v47 = vadd.f32 1.0, %v1896_v17  ;;  %v883_v29 = vpop.xlane.xlu1 %882  ;;  %122 = vadd.xlane.f32.xlu0 %v121_v31  ;;  %125 = vadd.xlane.f32.xlu1 %v124_v39 }
 0x315   :  { %v1634_v23 = vmul.f32 -1.442695, %v908_v1  ;;  %v909_v30 = vadd.f32 %v2524_v32, %v883_v29 }
 0x316   :  { %v1898_v40 = vpop.eup %1897  ;;  %1907 = vrcp.f32 %v969_v47  ;;  %v130_v47 = vsel %vm84_vm0, %v83_v57, 0.0  ;;  %vm1544_vm0 = vcmask 64512  }
 0x317   :  { %v1014_v16 = vmul.f32 0.3, %v1898_v40  ;;  %1909 = vpow2.f32 %v1634_v23  ;;  %v1635_v42 = vmul.f32 -1.442695, %v909_v30 }
 0x318   :  { %v1900_v19 = vpop.eup %1899  ;;  %128 = vadd.xlane.f32.xlu0 %v127_v49  ;;  %131 = vadd.xlane.f32.xlu1 %v130_v47 }
 0x319   :  { %v1902_v63 = vpop.eup %1901  ;;  %v1030_v53 = vadd.f32 0.5, %v1014_v16  ;;  %v1015_v14 = vmul.f32 0.3, %v1900_v19  ;;  %1911 = vpow2.f32 %v1635_v42 }
 0x31a   :  { %v970_v17 = vadd.f32 1.0, %v1902_v63  ;;  %v885_v54 = vpop.xlane.xlu0 %884 }
 0x31b   :  { %v1904_v35 = vpop.eup %1903  ;;  %v1046_v1 = vsub.f32 %v2371_v6, %v1030_v53  ;;  %v1031_v22 = vadd.f32 0.5, %v1015_v14  ;;  %v910_v15 = vadd.f32 %v2524_v32, %v885_v54 }
 0x31c   :  { %1913 = vrcp.f32 %v970_v17  ;;  %v971_v44 = vadd.f32 1.0, %v1904_v35  ;;  %v887_v29 = vpop.xlane.xlu1 %886 }
 0x31d   :  { %v1644_v23 = vmul.f32 -50.0, %v1046_v1  ;;  %v1047_v30 = vsub.f32 %v2374_v20, %v1031_v22  ;;  %v1636_v31 = vmul.f32 -1.442695, %v910_v15  ;;  %v911_v56 = vadd.f32 %v2524_v32, %v887_v29 }
 0x31e   :  { %v1906_v40 = vpop.eup %1905  ;;  %1915 = vrcp.f32 %v971_v44 }
 0x31f   :  { %v1094_v39 = vmul.f32 1.442695, %v1644_v23  ;;  %v1645_v6 = vmul.f32 -50.0, %v1047_v30  ;;  %v1016_v16 = vmul.f32 0.3, %v1906_v40  ;;  %1917 = vpow2.f32 %v1636_v31 }
 0x320   :  { %v1908_v42 = vpop.eup %1907  ;;  %v1637_v19 = vmul.f32 -1.442695, %v911_v56 }
 0x321   :  { %v1910_v57 = vpop.eup %1909  ;;  %1919 = vpow2.f32 %v1094_v39  ;;  %v1096_v63 = vmul.f32 1.442695, %v1645_v6  ;;  %v1032_v53 = vadd.f32 0.5, %v1016_v16  ;;  %v1017_v14 = vmul.f32 0.3, %v1908_v42 }
 0x322   :  { %v972_v49 = vadd.f32 1.0, %v1910_v57  ;;  %1921 = vpow2.f32 %v1637_v19  ;;  %v889_v20 = vpop.xlane.xlu0 %888 }
 0x323   :  { %v1912_v17 = vpop.eup %1911  ;;  %1923 = vpow2.f32 %v1096_v63  ;;  %v1048_v54 = vsub.f32 %v2383_v26, %v1032_v53  ;;  %v1033_v35 = vadd.f32 0.5, %v1017_v14  ;;  %v912_v1 = vadd.f32 %v2524_v32, %v889_v20 }
 0x324   :  { %1925 = vrcp.f32 %v972_v49  ;;  %v973_v22 = vadd.f32 1.0, %v1912_v17  ;;  %v891_v15 = vpop.xlane.xlu1 %890 }
 0x325   :  { %v1646_v47 = vmul.f32 -50.0, %v1048_v54  ;;  %v1049_v44 = vsub.f32 %v2387_v61, %v1033_v35  ;;  %v1638_v29 = vmul.f32 -1.442695, %v912_v1  ;;  %v913_v23 = vadd.f32 %v2524_v32, %v891_v15 }
 0x326   :  { %v1914_v30 = vpop.eup %1913  ;;  %1927 = vrcp.f32 %v973_v22 }
 0x327   :  { %v1098_v31 = vmul.f32 1.442695, %v1646_v47  ;;  %v1647_v56 = vmul.f32 -50.0, %v1049_v44  ;;  %v1018_v40 = vmul.f32 0.3, %v1914_v30  ;;  %1929 = vpow2.f32 %v1638_v29 }
 0x328   :  { %v1916_v39 = vpop.eup %1915  ;;  %v1639_v26 = vmul.f32 -1.442695, %v913_v23 }
 0x329   :  { %v1918_v6 = vpop.eup %1917  ;;  %1931 = vpow2.f32 %v1098_v31  ;;  %v1100_v16 = vmul.f32 1.442695, %v1647_v56  ;;  %v1034_v42 = vadd.f32 0.5, %v1018_v40  ;;  %v1019_v19 = vmul.f32 0.3, %v1916_v39 }
 0x32a   :  { %v974_v57 = vadd.f32 1.0, %v1918_v6  ;;  %1933 = vpow2.f32 %v1639_v26  ;;  %v893_v63 = vpop.xlane.xlu0 %892 }
 0x32b   :  { %v1920_v61 = vpop.eup %1919  ;;  %1935 = vpow2.f32 %v1100_v16  ;;  %v1050_v53 = vsub.f32 %v2391_v45, %v1034_v42  ;;  %v1035_v14 = vadd.f32 0.5, %v1019_v19  ;;  %v914_v49 = vadd.f32 %v2524_v32, %v893_v63 }
 0x32c   :  { %v1922_v20 = vpop.eup %1921  ;;  %v1126_v17 = vadd.f32 1.0, %v1920_v61  ;;  %1937 = vrcp.f32 %v974_v57  ;;  %v895_v54 = vpop.xlane.xlu1 %894 }
 0x32d   :  { %v1924_v35 = vpop.eup %1923  ;;  %v1648_v1 = vmul.f32 -50.0, %v1050_v53  ;;  %v1051_v22 = vsub.f32 %v2395_v9, %v1035_v14  ;;  %v975_v15 = vadd.f32 1.0, %v1922_v20  ;;  %v1640_v29 = vmul.f32 -1.442695, %v914_v49 }
 0x32e   :  { %v1926_v47 = vpop.eup %1925  ;;  %1939 = vrcp.f32 %v1126_v17  ;;  %v1127_v44 = vadd.f32 1.0, %v1924_v35  ;;  %v915_v23 = vadd.f32 %v2524_v32, %v895_v54 }
 0x32f   :  { %v1102_v30 = vmul.f32 1.442695, %v1648_v1  ;;  %v1649_v45 = vmul.f32 -50.0, %v1051_v22  ;;  %v1020_v31 = vmul.f32 0.3, %v1926_v47  ;;  %1941 = vrcp.f32 %v975_v15 }
 0x330   :  { %v1928_v56 = vpop.eup %1927  ;;  %1943 = vrcp.f32 %v1127_v44  ;;  %v1641_v40 = vmul.f32 -1.442695, %v915_v23 }
 0x331   :  { %v1930_v39 = vpop.eup %1929  ;;  %1945 = vpow2.f32 %v1102_v30  ;;  %v1104_v26 = vmul.f32 1.442695, %v1649_v45  ;;  %v1036_v6 = vadd.f32 0.5, %v1020_v31  ;;  %v1021_v16 = vmul.f32 0.3, %v1928_v56 }
 0x332   :  { %v976_v9 = vadd.f32 1.0, %v1930_v39  ;;  %1947 = vpow2.f32 %v1640_v29  ;;  %v897_v42 = vpop.xlane.xlu0 %896 }
 0x333   :  { %v1932_v19 = vpop.eup %1931  ;;  %1949 = vpow2.f32 %v1104_v26  ;;  %v1052_v57 = vsub.f32 %v2399_v0, %v1036_v6  ;;  %v1037_v63 = vadd.f32 0.5, %v1021_v16  ;;  %v916_v61 = vadd.f32 %v2524_v32, %v897_v42 }
 0x334   :  { %v1934_v53 = vpop.eup %1933  ;;  %v1128_v14 = vadd.f32 1.0, %v1932_v19  ;;  %1951 = vrcp.f32 %v976_v9  ;;  %v899_v49 = vpop.xlane.xlu1 %898 }
 0x335   :  { %v1936_v20 = vpop.eup %1935  ;;  %v1650_v17 = vmul.f32 -50.0, %v1052_v57  ;;  %v1053_v54 = vsub.f32 %v2403_v10, %v1037_v63  ;;  %v977_v35 = vadd.f32 1.0, %v1934_v53  ;;  %1953 = vpow2.f32 %v1641_v40 }
 0x336   :  { %v1938_v1 = vpop.eup %1937  ;;  %1955 = vrcp.f32 %v1128_v14  ;;  %v1129_v22 = vadd.f32 1.0, %v1936_v20  ;;  %v1642_v15 = vmul.f32 -1.442695, %v916_v61  ;;  %v917_v47 = vadd.f32 %v2524_v32, %v899_v49 }
 0x337   :  { %v1106_v0 = vmul.f32 1.442695, %v1650_v17  ;;  %v1651_v44 = vmul.f32 -50.0, %v1053_v54  ;;  %v1022_v29 = vmul.f32 0.3, %v1938_v1  ;;  %1957 = vrcp.f32 %v977_v35 }
 0x338   :  { %v2590_v23 = vpop.eup %1939  ;;  %1959 = vrcp.f32 %v1129_v22  ;;  %v1643_v30 = vmul.f32 -1.442695, %v917_v47 }
 0x339   :  { %v1942_v45 = vpop.eup %1941  ;;  %1961 = vpow2.f32 %v1106_v0  ;;  %v1108_v31 = vmul.f32 1.442695, %v1651_v44  ;;  %v1038_v10 = vadd.f32 0.5, %v1022_v29  ;;  %v1174_v56 = vmul.f32 %v2590_v23, %v2201_v24 }
 0x33a   :  { %v2594_v40 = vpop.eup %1943  ;;  %v1023_v39 = vmul.f32 0.3, %v1942_v45  ;;  %1963 = vpow2.f32 %v1642_v15 }
 0x33b   :  { %v1946_v32 = vpop.eup %1945  ;;  %1965 = vpow2.f32 %v1108_v31  ;;  %v1054_v26 = vsub.f32 %v2407_v3, %v1038_v10  ;;  %v1175_v6 = vmul.f32 %v2594_v40, %v2204_v27  ;;  %v1359_v16 = vpack.c.bf16 %v2594_v40, %v2590_v23 }
 0x33c   :  { %v1948_v9 = vpop.eup %1947  ;;  %v1130_v42 = vadd.f32 1.0, %v1946_v32  ;;  %v1039_v19 = vadd.f32 0.5, %v1023_v39  ;;  %1967 = vpow2.f32 %v1643_v30 }
 0x33d   :  { %v1950_v57 = vpop.eup %1949  ;;  %v1652_v24 = vmul.f32 -50.0, %v1054_v26  ;;  %v978_v63 = vadd.f32 1.0, %v1948_v9  ;;  %v1190_v61 = vpack.c.bf16 %v1175_v6, %v1174_v56 }
 0x33e   :  { %v1952_v53 = vpop.eup %1951  ;;  %1969 = vrcp.f32 %v1130_v42  ;;  %v1131_v14 = vadd.f32 1.0, %v1950_v57  ;;  %v1055_v49 = vsub.f32 %v2411_v25, %v1039_v19 }
 0x33f   :  { %v1954_v3 = vpop.eup %1953  ;;  %v1110_v20 = vmul.f32 1.442695, %v1652_v24  ;;  %v1024_v17 = vmul.f32 0.3, %v1952_v53  ;;  %1971 = vrcp.f32 %v978_v63  ;;  %1724 = vmatprep.mubr.bf16.mxu0 %v1190_v61 }
 0x340   :  { %v2602_v27 = vpop.eup %1955  ;;  %1973 = vrcp.f32 %v1131_v14  ;;  %v1653_v54 = vmul.f32 -50.0, %v1055_v49  ;;  %v979_v35 = vadd.f32 1.0, %v1954_v3 }
 0x341   :  { %v1958_v1 = vpop.eup %1957  ;;  %1975 = vpow2.f32 %v1110_v20  ;;  %v1040_v22 = vadd.f32 0.5, %v1024_v17  ;;  %v1176_v15 = vmul.f32 %v2602_v27, %v2211_v34 }
 0x342   :  { %v2606_v47 = vpop.eup %1959  ;;  %v1112_v0 = vmul.f32 1.442695, %v1653_v54  ;;  %v1025_v25 = vmul.f32 0.3, %v1958_v1  ;;  %1977 = vrcp.f32 %v979_v35 }
 0x343   :  { %v1962_v44 = vpop.eup %1961  ;;  %v1056_v29 = vsub.f32 %v2415_v37, %v1040_v22  ;;  %v1177_v30 = vmul.f32 %v2606_v47, %v2216_v38  ;;  %v1360_v45 = vpack.c.bf16 %v2606_v47, %v2602_v27 }
 0x344   :  { %v1964_v31 = vpop.eup %1963  ;;  %v1132_v10 = vadd.f32 1.0, %v1962_v44  ;;  %1979 = vpow2.f32 %v1112_v0  ;;  %v1041_v56 = vadd.f32 0.5, %v1025_v25 }
 0x345   :  { %v1966_v39 = vpop.eup %1965  ;;  %v1654_v34 = vmul.f32 -50.0, %v1056_v29  ;;  %v980_v32 = vadd.f32 1.0, %v1964_v31  ;;  %v1191_v26 = vpack.c.bf16 %v1177_v30, %v1176_v15 }
 0x346   :  { %v1968_v6 = vpop.eup %1967  ;;  %1981 = vrcp.f32 %v1132_v10  ;;  %v1133_v9 = vadd.f32 1.0, %v1966_v39  ;;  %v1057_v42 = vsub.f32 %v2419_v43, %v1041_v56 }
 0x347   :  { %v1114_v37 = vmul.f32 1.442695, %v1654_v34  ;;  %1983 = vrcp.f32 %v980_v32  ;;  %v981_v19 = vadd.f32 1.0, %v1968_v6  ;;  %1725 = vmatmul.mubr.bf16.vlgmr.msra.gmra.mrb[32].mxu0 %v1191_v26 }
 0x348   :  { %v1970_v38 = vpop.eup %1969  ;;  %1985 = vrcp.f32 %v1133_v9  ;;  %v1655_v57 = vmul.f32 -50.0, %v1057_v42  ;;  %1741 = vmatpush3.bf16.msra.mxu0 %v2455_v48 }
 0x349   :  { %v1972_v24 = vpop.eup %1971  ;;  %1987 = vpow2.f32 %v1114_v37  ;;  %v1178_v63 = vmul.f32 %v1970_v38, %v2225_v46  ;;  %1742 = vmatprep.subr.bf16.mxu0 %v2465_v51 }
 0x34a   :  { %v1974_v61 = vpop.eup %1973  ;;  %v1116_v53 = vmul.f32 1.442695, %v1655_v57  ;;  %v1026_v14 = vmul.f32 0.3, %v1972_v24  ;;  %1989 = vrcp.f32 %v981_v19 }
 0x34b   :  { %v1976_v43 = vpop.eup %1975  ;;  %v1361_v49 = vpack.c.bf16 %v1974_v61, %v1970_v38  ;;  %v1179_v3 = vmul.f32 %v1974_v61, %v2230_v50 }
 0x34c   :  { %v1978_v20 = vpop.eup %1977  ;;  %v1134_v17 = vadd.f32 1.0, %v1976_v43  ;;  %1991 = vpow2.f32 %v1116_v53  ;;  %v1042_v54 = vadd.f32 0.5, %v1026_v14  ;;  %1743 = vmatpush3.bf16.msra.mxu0 %v2465_v51 }
 0x34d   :  { %v1027_v48 = vmul.f32 0.3, %v1978_v20  ;;  %1760 = vmatprep.mubr.bf16.mxu1 %v1361_v49  ;;  %v1192_v35 = vpack.c.bf16 %v1179_v3, %v1178_v63  ;;  %1744 = vmatprep.subr.bf16.mxu0 %v2475_v55 }
 0x34e   :  { %v1980_v46 = vpop.eup %1979  ;;  %1993 = vrcp.f32 %v1134_v17  ;;  %v1058_v1 = vsub.f32 %v2423_v59, %v1042_v54 }
 0x34f   :  { %v1135_v22 = vadd.f32 1.0, %v1980_v46  ;;  %v1043_v15 = vadd.f32 0.5, %v1027_v48  ;;  %1728 = vmatprep.mubr.bf16.mxu0 %v1192_v35 }
 0x350   :  { %v1982_v0 = vpop.eup %1981  ;;  %v1656_v50 = vmul.f32 -50.0, %v1058_v1  ;;  %1745 = vmatpush3.bf16.msra.mxu0 %v2475_v55 }
 0x351   :  { %v1984_v25 = vpop.eup %1983  ;;  %1995 = vrcp.f32 %v1135_v22  ;;  %v1059_v51 = vsub.f32 %v2427_v28, %v1043_v15  ;;  %v1180_v44 = vmul.f32 %v1982_v0, %v2245_v60  ;;  %1746 = vmatprep.subr.bf16.mxu0 %v2485_v62 }
 0x352   :  { %v1986_v29 = vpop.eup %1985  ;;  %v1118_v30 = vmul.f32 1.442695, %v1656_v50  ;;  %v1028_v31 = vmul.f32 0.3, %v1984_v25 }
 0x353   :  { %v1988_v10 = vpop.eup %1987  ;;  %v1657_v59 = vmul.f32 -50.0, %v1059_v51  ;;  %v1362_v56 = vpack.c.bf16 %v1986_v29, %v1982_v0  ;;  %v1181_v39 = vmul.f32 %v1986_v29, %v2252_v2 }
 0x354   :  { %v1990_v34 = vpop.eup %1989  ;;  %v1136_v32 = vadd.f32 1.0, %v1988_v10  ;;  %1997 = vpow2.f32 %v1118_v30  ;;  %v1044_v55 = vadd.f32 0.5, %v1028_v31  ;;  %1747 = vmatpush3.bf16.msra.mxu0 %v2485_v62 }
 0x355   :  { %v1120_v26 = vmul.f32 1.442695, %v1657_v59  ;;  %v1029_v28 = vmul.f32 0.3, %v1990_v34  ;;  %1761 = vmatmul.mubr.bf16.vlgmr.msra.gmra.mrb[32].mxu1 %v1362_v56  ;;  %v1193_v60 = vpack.c.bf16 %v1181_v39, %v1180_v44  ;;  %1748 = vmatprep.subr.bf16.mxu0 %v2495_v36 }
 0x356   :  { %v1992_v6 = vpop.eup %1991  ;;  %1999 = vrcp.f32 %v1136_v32  ;;  %v1060_v9 = vsub.f32 %v2431_v12, %v1044_v55 }
 0x357   :  { %v1137_v42 = vadd.f32 1.0, %v1992_v6  ;;  %2001 = vpow2.f32 %v1120_v26  ;;  %v1045_v37 = vadd.f32 0.5, %v1029_v28  ;;  %1729 = vmatmul.mubr.bf16.gmra.mrb[36].mxu0 %v1193_v60 }
 0x358   :  { %v1994_v2 = vpop.eup %1993  ;;  %v1658_v19 = vmul.f32 -50.0, %v1060_v9  ;;  %1749 = vmatpush3.bf16.msra.mxu0 %v2495_v36 }
 0x359   :  { %2003 = vrcp.f32 %v1137_v42  ;;  %v1061_v62 = vsub.f32 %v2435_v21, %v1045_v37  ;;  %v1182_v38 = vmul.f32 %v1994_v2, %v2271_v13  ;;  %1750 = vmatprep.subr.bf16.mxu0 %v2503_v4 }
 0x35a   :  { %v1122_v57 = vmul.f32 1.442695, %v1658_v19 }
 0x35b   :  { %v1996_v24 = vpop.eup %1995  ;;  %v1659_v63 = vmul.f32 -50.0, %v1061_v62 }
 0x35c   :  { %2005 = vpow2.f32 %v1122_v57  ;;  %v1363_v12 = vpack.c.bf16 %v1996_v24, %v1994_v2  ;;  %v1183_v61 = vmul.f32 %v1996_v24, %v2278_v18  ;;  %1751 = vmatpush3.bf16.msra.mxu0 %v2503_v4 }
 0x35d   :  { %v1124_v53 = vmul.f32 1.442695, %v1659_v63  ;;  %1752 = vmatprep.subr.bf16.mxu0 %v2510_v7 }
 0x35e   :  { %v1998_v36 = vpop.eup %1997  ;;  %1764 = vmatprep.mubr.bf16.mxu1 %v1363_v12  ;;  %v1194_v14 = vpack.c.bf16 %v1183_v61, %v1182_v38 }
 0x35f   :  { %v1138_v21 = vadd.f32 1.0, %v1998_v36  ;;  %2007 = vpow2.f32 %v1124_v53 }
 0x360   :  { %v2000_v13 = vpop.eup %1999  ;;  %1732 = vmatprep.mubr.bf16.mxu0 %v1194_v14  ;;  %1753 = vmatpush3.bf16.msra.mxu0 %v2510_v7 }
 0x361   :  { %v2002_v43 = vpop.eup %2001  ;;  %2009 = vrcp.f32 %v1138_v21  ;;  %v1184_v49 = vmul.f32 %v2000_v13, %v2297_v33  ;;  %1754 = vmatprep.subr.bf16.mxu0 %v2517_v8 }
 0x362   :  { %v1139_v18 = vadd.f32 1.0, %v2002_v43 }
 0x363   :  { %v2004_v4 = vpop.eup %2003 }
 0x364   :  { %2011 = vrcp.f32 %v1139_v18  ;;  %v1364_v3 = vpack.c.bf16 %v2004_v4, %v2000_v13  ;;  %v1185_v20 = vmul.f32 %v2004_v4, %v2304_v41  ;;  %1755 = vmatpush3.bf16.msra.mxu0 %v2517_v8 }
 0x366   :  { %v2006_v17 = vpop.eup %2005  ;;  %1765 = vmatmul.mubr.bf16.gmra.mrb[36].mxu1 %v1364_v3  ;;  %v1195_v54 = vpack.c.bf16 %v1185_v20, %v1184_v49 }
 0x367   :  { %v1140_v48 = vadd.f32 1.0, %v2006_v17 }
 0x368   :  { %1733 = vmatmul.mubr.bf16.gmra.mrb[40].mxu0 %v1195_v54 }
 0x369   :  { %v2008_v7 = vpop.eup %2007  ;;  %2013 = vrcp.f32 %v1140_v48 }
 0x36a   :  { %v1141_v35 = vadd.f32 1.0, %v2008_v7 }
 0x36b   :  { %v2010_v46 = vpop.eup %2009 }
 0x36c   :  { %2015 = vrcp.f32 %v1141_v35  ;;  %v1186_v33 = vmul.f32 %v2010_v46, %v2311_v52  ;;  %v87_v52 = vpop.xlane.xlu0 %86 }
 0x36d   :  { %v133_v31 = vmax.f32 %v87_v52, 1e-24 }
 0x36e   :  { %v2012_v1 = vpop.eup %2011 }
 0x36f   :  { %v1365_v22 = vpack.c.bf16 %v2012_v1, %v2010_v46  ;;  %v1187_v15 = vmul.f32 %v2012_v1, %v2318_v58  ;;  %v90_v58 = vpop.xlane.xlu1 %89 }
 0x370   :  { %v93_v29 = vpop.xlane.xlu0 %92  ;;  %v134_v59 = vmax.f32 %v90_v58, 1e-24 }
 0x371   :  { %1768 = vmatprep.mubr.bf16.mxu1 %v1365_v22  ;;  %v1196_v41 = vpack.c.bf16 %v1187_v15, %v1186_v33 }
 0x373   :  { %v2014_v0 = vpop.eup %2013  ;;  %1736 = vmatprep.mubr.bf16.mxu0 %v1196_v41  ;;  %v96_v30 = vpop.xlane.xlu1 %95 }
 0x374   :  { %v1188_v8 = vmul.f32 %v2014_v0, %v2325_v5  ;;  %v135_v5 = vmax.f32 %v93_v29, 1e-24  ;;  %v136_v10 = vmax.f32 %v96_v30, 1e-24 }
 0x376   :  { %v2016_v50 = vpop.eup %2015  ;;  %2017 = vrsqrt.f32 %v135_v5 }
 0x377   :  { %v1366_v25 = vpack.c.bf16 %v2016_v50, %v2014_v0  ;;  %v1189_v51 = vmul.f32 %v2016_v50, %v2332_v11  ;;  %2019 = vrsqrt.f32 %v133_v31 }
 0x378   :  { %2021 = vrsqrt.f32 %v136_v10 }
 0x379   :  { %1769 = vmatmul.mubr.bf16.gmra.mrb[40].mxu1 %v1366_v25  ;;  %v1197_v44 = vpack.c.bf16 %v1189_v51, %v1188_v8  ;;  %2023 = vrsqrt.f32 %v134_v59 }
 0x37b   :  { %1737 = vmatmul.mubr.bf16.gmra.mrb[44].mxu0 %v1197_v44 }
 0x37c   :  { %1756 = vmatprep.mubr.bf16.mxu0 %v1359_v16 }
 0x380   :  { %v2018_v40 = vpop.eup %2017 }
 0x381   :  { %v2020_v16 = vpop.eup %2019 }
 0x382   :  { %v2022_v27 = vpop.eup %2021 }
 0x383   :  { %1757 = vmatmul.mubr.bf16.vlgmr.msra.gmra.mrb[48].mxu0 %v1360_v45  ;;  %v2024_v34 = vpop.eup %2023 }
 0x391   :  { %v99_v11 = vpop.xlane.xlu0 %98  ;;  %v102_v56 = vpop.xlane.xlu1 %101 }
 0x392   :  { %v137_v32 = vmax.f32 %v99_v11, 1e-24  ;;  %v138_v9 = vmax.f32 %v102_v56, 1e-24 }
 0x395   :  { %v105_v23 = vpop.xlane.xlu0 %104  ;;  %v108_v39 = vpop.xlane.xlu1 %107 }
 0x396   :  { %v139_v45 = vmax.f32 %v105_v23, 1e-24  ;;  %v140_v6 = vmax.f32 %v108_v39, 1e-24 }
 0x398   :  { %2025 = vrsqrt.f32 %v139_v45 }
 0x399   :  { %2027 = vrsqrt.f32 %v137_v32  ;;  %v111_v19 = vpop.xlane.xlu0 %110  ;;  %v114_v62 = vpop.xlane.xlu1 %113 }
 0x39a   :  { %2029 = vrsqrt.f32 %v140_v6  ;;  %v141_v4 = vmax.f32 %v111_v19, 1e-24  ;;  %v142_v7 = vmax.f32 %v114_v62, 1e-24 }
 0x39b   :  { %2031 = vrsqrt.f32 %v138_v9 }
 0x39d   :  { %v117_v24 = vpop.xlane.xlu0 %116  ;;  %v120_v61 = vpop.xlane.xlu1 %119 }
 0x39e   :  { %v143_v18 = vmax.f32 %v117_v24, 1e-24  ;;  %v144_v48 = vmax.f32 %v120_v61, 1e-24 }
 0x3a0   :  { %2033 = vrsqrt.f32 %v143_v18 }
 0x3a1   :  { %2035 = vrsqrt.f32 %v141_v4  ;;  %v123_v46 = vpop.xlane.xlu0 %122  ;;  %v126_v33 = vpop.xlane.xlu1 %125 }
 0x3a2   :  { %v2026_v38 = vpop.eup %2025  ;;  %2037 = vrsqrt.f32 %v144_v48  ;;  %v145_v11 = vmax.f32 %v123_v46, 1e-24 }
 0x3a3   :  { %v2028_v63 = vpop.eup %2027  ;;  %2039 = vrsqrt.f32 %v142_v7 }
 0x3a4   :  { %v2030_v53 = vpop.eup %2029 }
 0x3a5   :  { %v2032_v21 = vpop.eup %2031  ;;  %v129_v0 = vpop.xlane.xlu0 %128 }
 0x3a6   :  { %v132_v5 = vpop.xlane.xlu1 %131  ;;  %v147_v59 = vmax.f32 %v129_v0, 1e-24 }
 0x3a7   :  { %v148_v23 = vmax.f32 %v132_v5, 1e-24 }
 0x3a8   :  { %2041 = vrsqrt.f32 %v147_v59 }
 0x3a9   :  { %2043 = vrsqrt.f32 %v145_v11 }
 0x3aa   :  { %v2034_v1 = vpop.eup %2033  ;;  %2045 = vrsqrt.f32 %v148_v23 }
 0x3ab   :  { %v2036_v15 = vpop.eup %2035 }
 0x3ac   :  { %v2038_v8 = vpop.eup %2037 }
 0x3ad   :  { %v2040_v51 = vpop.eup %2039 }
 0x41a   :  { %v1726_v47 = vpop.f32.mrb[32].mxu0 }
 0x41b   :  { %v1530_v55 = vmul.f32 %v2018_v40, %v1726_v47  ;;  %v1296_v26 = vpop.f32.mrb[33].mxu0  ;;  %v146_v40 = vmax.f32 %v126_v33, 1e-24 }
 0x41c   :  { %v1528_v28 = vmul.f32 %v2020_v16, %v1296_v26  ;;  %v1727_v60 = vpop.f32.mrb[34].mxu0  ;;  %v2042_v16 = vpop.eup %2041 }
 0x41d   :  { %1547 = vst.msk [vmem:[%s2788_s9 + $0x10] sm:$0xff] %vm1544_vm0, %v1530_v55  ;;  %v1531_v42 = vmul.f32 %v2022_v27, %v1727_v60  ;;  %v1299_v37 = vpop.f32.mrb[35].mxu0  ;;  %2047 = vrsqrt.f32 %v146_v40  ;;  %v2044_v27 = vpop.eup %2043 }
 0x41e   :  { %1545 = vst.msk [vmem:[%s2788_s9] sm:$0xff] %vm1544_vm0, %v1528_v28  ;;  %v1529_v2 = vmul.f32 %v2024_v34, %v1299_v37  ;;  %v2046_v45 = vpop.eup %2045 }
 0x41f   :  { %1548 = vst.msk [vmem:[%s2788_s9 + $0x18] sm:$0xff] %vm1544_vm0, %v1531_v42 }
 0x420   :  { %1546 = vst.msk [vmem:[%s2788_s9 + $0x8] sm:$0xff] %vm1544_vm0, %v1529_v2 }
 0x427   :  { %v2048_v55 = vpop.eup %2047 }
 0x428   :  { %v1762_v57 = vpop.f32.mrb[32].mxu1 }
 0x429   :  { %1567 = vst.msk [vmem:[%s2789_s10 + $0x30] sm:$0xff] %vm1544_vm0, %v1762_v57  ;;  %v1481_v12 = vpop.f32.mrb[33].mxu1 }
 0x42a   :  { %1565 = vst.msk [vmem:[%s2789_s10 + $0x20] sm:$0xff] %vm1544_vm0, %v1481_v12  ;;  %v1730_v36 = vpop.f32.mrb[36].mxu0  ;;  %v1763_v14 = vpop.f32.mrb[34].mxu1 }
 0x42b   :  { %v1534_v13 = vmul.f32 %v2026_v38, %v1730_v36  ;;  %1568 = vst.msk [vmem:[%s2789_s10 + $0x38] sm:$0xff] %vm1544_vm0, %v1763_v14  ;;  %v1312_v43 = vpop.f32.mrb[37].mxu0  ;;  %v1484_v49 = vpop.f32.mrb[35].mxu1 }
 0x42c   :  { %v1532_v3 = vmul.f32 %v2028_v63, %v1312_v43  ;;  %1566 = vst.msk [vmem:[%s2789_s10 + $0x28] sm:$0xff] %vm1544_vm0, %v1484_v49  ;;  %v1731_v20 = vpop.f32.mrb[38].mxu0 }
 0x42d   :  { %1551 = vst.msk [vmem:[%s2788_s9 + $0x30] sm:$0xff] %vm1544_vm0, %v1534_v13  ;;  %v1535_v17 = vmul.f32 %v2030_v53, %v1731_v20  ;;  %v1315_v54 = vpop.f32.mrb[39].mxu0 }
 0x42e   :  { %1549 = vst.msk [vmem:[%s2788_s9 + $0x20] sm:$0xff] %vm1544_vm0, %v1532_v3  ;;  %v1533_v35 = vmul.f32 %v2032_v21, %v1315_v54 }
 0x42f   :  { %1552 = vst.msk [vmem:[%s2788_s9 + $0x38] sm:$0xff] %vm1544_vm0, %v1535_v17 }
 0x430   :  { %1550 = vst.msk [vmem:[%s2788_s9 + $0x28] sm:$0xff] %vm1544_vm0, %v1533_v35 }
 0x439   :  { %v1766_v22 = vpop.f32.mrb[36].mxu1 }
 0x43a   :  { %1571 = vst.msk [vmem:[%s2789_s10 + $0x50] sm:$0xff] %vm1544_vm0, %v1766_v22  ;;  %v1497_v41 = vpop.f32.mrb[37].mxu1 }
 0x43b   :  { %1569 = vst.msk [vmem:[%s2789_s10 + $0x40] sm:$0xff] %vm1544_vm0, %v1497_v41  ;;  %v1734_v50 = vpop.f32.mrb[40].mxu0  ;;  %v1767_v25 = vpop.f32.mrb[38].mxu1 }
 0x43c   :  { %v1538_v44 = vmul.f32 %v2034_v1, %v1734_v50  ;;  %1572 = vst.msk [vmem:[%s2789_s10 + $0x58] sm:$0xff] %vm1544_vm0, %v1767_v25  ;;  %v1328_v52 = vpop.f32.mrb[41].mxu0  ;;  %v1500_v58 = vpop.f32.mrb[39].mxu1 }
 0x43d   :  { %v1536_v29 = vmul.f32 %v2036_v15, %v1328_v52  ;;  %1570 = vst.msk [vmem:[%s2789_s10 + $0x48] sm:$0xff] %vm1544_vm0, %v1500_v58  ;;  %v1735_v30 = vpop.f32.mrb[42].mxu0 }
 0x43e   :  { %1555 = vst.msk [vmem:[%s2788_s9 + $0x50] sm:$0xff] %vm1544_vm0, %v1538_v44  ;;  %v1539_v31 = vmul.f32 %v2038_v8, %v1735_v30  ;;  %v1331_v10 = vpop.f32.mrb[43].mxu0 }
 0x43f   :  { %1553 = vst.msk [vmem:[%s2788_s9 + $0x40] sm:$0xff] %vm1544_vm0, %v1536_v29  ;;  %v1537_v56 = vmul.f32 %v2040_v51, %v1331_v10 }
 0x440   :  { %1556 = vst.msk [vmem:[%s2788_s9 + $0x58] sm:$0xff] %vm1544_vm0, %v1539_v31 }
 0x441   :  { %1554 = vst.msk [vmem:[%s2788_s9 + $0x48] sm:$0xff] %vm1544_vm0, %v1537_v56 }
 0x44c   :  { %v1770_v39 = vpop.f32.mrb[40].mxu1 }
 0x44d   :  { %1575 = vst.msk [vmem:[%s2789_s10 + $0x70] sm:$0xff] %vm1544_vm0, %v1770_v39  ;;  %v1513_v47 = vpop.f32.mrb[41].mxu1 }
 0x44e   :  { %1573 = vst.msk [vmem:[%s2789_s10 + $0x60] sm:$0xff] %vm1544_vm0, %v1513_v47  ;;  %v1738_v34 = vpop.f32.mrb[44].mxu0  ;;  %v1771_v32 = vpop.f32.mrb[42].mxu1 }
 0x44f   :  { %v1542_v26 = vmul.f32 %v2042_v16, %v1738_v34  ;;  %1576 = vst.msk [vmem:[%s2789_s10 + $0x78] sm:$0xff] %vm1544_vm0, %v1771_v32  ;;  %v1344_v28 = vpop.f32.mrb[45].mxu0  ;;  %v1516_v60 = vpop.f32.mrb[43].mxu1 }
 0x450   :  { %v1540_v6 = vmul.f32 %v2044_v27, %v1344_v28  ;;  %1574 = vst.msk [vmem:[%s2789_s10 + $0x68] sm:$0xff] %vm1544_vm0, %v1516_v60  ;;  %v1739_v9 = vpop.f32.mrb[46].mxu0 }
 0x451   :  { %1559 = vst.msk [vmem:[%s2788_s9 + $0x70] sm:$0xff] %vm1544_vm0, %v1542_v26  ;;  %v1543_v42 = vmul.f32 %v2046_v45, %v1739_v9  ;;  %v1347_v37 = vpop.f32.mrb[47].mxu0 }
 0x452   :  { %1557 = vst.msk [vmem:[%s2788_s9 + $0x60] sm:$0xff] %vm1544_vm0, %v1540_v6  ;;  %v1541_v2 = vmul.f32 %v2048_v55, %v1347_v37 }
 0x453   :  { %1560 = vst.msk [vmem:[%s2788_s9 + $0x78] sm:$0xff] %vm1544_vm0, %v1543_v42 }
 0x454   :  { %1558 = vst.msk [vmem:[%s2788_s9 + $0x68] sm:$0xff] %vm1544_vm0, %v1541_v2 }
 0x456   :  { %v1758_v19 = vpop.f32.mrb[48].mxu0 }
 0x457   :  { %1563 = vst.msk [vmem:[%s2789_s10 + $0x10] sm:$0xff] %vm1544_vm0, %v1758_v19  ;;  %v1465_v62 = vpop.f32.mrb[49].mxu0 }
 0x458   :  { %1561 = vst.msk [vmem:[%s2789_s10] sm:$0xff] %vm1544_vm0, %v1465_v62  ;;  %v1759_v38 = vpop.f32.mrb[50].mxu0 }
 0x459   :  { %1564 = vst.msk [vmem:[%s2789_s10 + $0x18] sm:$0xff] %vm1544_vm0, %v1759_v38  ;;  %v1468_v57 = vpop.f32.mrb[51].mxu0 }
 0x45a   :  { %1562 = vst.msk [vmem:[%s2789_s10 + $0x8] sm:$0xff] %vm1544_vm0, %v1468_v57 }

</bundles_post_ra>
